<compile_context>
chip_gen: v7x
topology: tpu7x:2x2x1
jax: 0.10.0
libtpu: 0.0.40
codegen_flags: <defaults>
</compile_context>

<pallas_src>
import functools
import math

import jax
import jax.numpy as jnp
from jax.experimental import pallas as pl
from jax.experimental.pallas import tpu as pltpu

CFG = dict(vocab=100, hidden=32, layers=2, heads=2, head_dim=16,
           intermediate=64, max_pos=16, type_vocab=2)

NUM_LABELS = 2
OUT_PAD = 128          # lane-dense classifier output width (sliced to 2 in JAX)


# ----------------------------- pallas helpers ------------------------------

def _full_spec(shape):
    """One full-array VMEM block (grid=(1,))."""
    n = len(shape)
    return pl.BlockSpec(shape, lambda i, n=n: (0,) * n)


# ------------------------------ fused kernel --------------------------------

def _bert_forward_kernel(
    ids_ref, tt_ref, mask_ref,
    word_emb_ref, pos_emb_ref, type_emb_ref,
    emb_ln_g_ref, emb_ln_b_ref,
    wqkv_ref, bqkv_ref, wo_ref, bo_ref,
    ln1_g_ref, ln1_b_ref,
    w1_ref, b1_ref, w2_ref, b2_ref,
    ln2_g_ref, ln2_b_ref,
    pool_w_ref, pool_b_ref, cls_w_ref, cls_b_ref,
    out_ref,
    *, num_layers, B, S, nH, Dh, row_pad, eps):
    """Whole BERT-IR forward (embeddings -> encoder -> pooler -> IR head)."""
    H = nH * Dh
    BS = B * S
    V = word_emb_ref.shape[0]
    f32 = jnp.float32
    bf16 = jnp.bfloat16

    def layernorm(x, g, b):
        mu = jnp.mean(x, axis=-1, keepdims=True)
        var = jnp.mean((x - mu) ** 2, axis=-1, keepdims=True)
        return (x - mu) * jax.lax.rsqrt(var + eps) * g + b

    # ---------------- fused embedding lookup (tables resident in VMEM) ------
    ids = ids_ref[...]                                                  # [BS,1] i32
    onehot = (ids == jax.lax.broadcasted_iota(jnp.int32, (BS, V), 1)).astype(f32)
    word_e = jnp.dot(onehot, word_emb_ref[...],
                     preferred_element_type=f32)                        # [BS, H]

    # position embeddings: rows 0..S-1 broadcast over the batch
    pos_e = jnp.broadcast_to(pos_emb_ref[0:S, :][None], (B, S, H)).reshape(BS, H)

    # token-type embeddings (type vocab == 2 -> a select beats a K=2 matmul)
    tt = tt_ref[...]                                                    # [BS,1] i32
    type_e = jnp.where(tt == 0, type_emb_ref[0:1, :], type_emb_ref[1:2, :])

    x = layernorm(word_e + pos_e + type_e,
                  emb_ln_g_ref[...], emb_ln_b_ref[...])                 # [BS,H] f32

    # ---- additive attention mask, built ONCE (hoisted out of the layer loop)
    neg = (1.0 - mask_ref[...].astype(f32)) * -1e9                      # [B, S]
    neg3 = jnp.broadcast_to(neg.reshape(B, 1, S), (B, S, S))            # [B, S, S]
    mask_b = jnp.concatenate([neg3] * nH, axis=0)                       # [nH*B,S,S]

    # ---------------- encoder layers (Python-unrolled; L is tiny) -----------
    # TODO(synk): switch to lax.fori_loop with dynamic wqkv_ref[l] indexing if
    # num_layers grows beyond a handful (vreg live-range pressure).
    for l in range(num_layers):
        # fused QKV projection; 1/sqrt(Dh) already folded into the Q slice
        qkv = jnp.dot(x.astype(bf16), wqkv_ref[l],
                      preferred_element_type=f32) + bqkv_ref[l]         # [BS,3H] f32

        # head-batched q/k/v: [nH*B, S, Dh], batch index = h*B + b
        # (leading-dim concatenates only; no lane-dim transposes)
        def to_heads(base, qkv=qkv):
            parts = [qkv[:, base + h * Dh: base + (h + 1) * Dh].reshape(B, S, Dh)
                     for h in range(nH)]
            return jnp.concatenate(parts, axis=0).astype(bf16)

        q_h = to_heads(0)
        k_h = to_heads(H)
        v_h = to_heads(2 * H)

        # all heads & batch items in ONE QK^T, ONE softmax, ONE P@V
        s = jnp.einsum("bqd,bkd->bqk", q_h, k_h,
                       preferred_element_type=f32) + mask_b             # [nH*B,S,S]
        p = jnp.exp(s - jnp.max(s, axis=-1, keepdims=True))
        a = p * pl.reciprocal(jnp.sum(p, axis=-1, keepdims=True), approx=True)
        ctx = jnp.einsum("bqk,bkd->bqd", a.astype(bf16), v_h,
                         preferred_element_type=f32)                    # [nH*B,S,Dh]

        # output projection: head merge folded into W_o row blocks
        wo_l = wo_ref[l]                                                # [H, H] bf16
        attn = jnp.zeros((BS, H), f32)
        for h in range(nH):
            ctx_h = ctx[h * B:(h + 1) * B].reshape(BS, Dh).astype(bf16)
            attn = attn + jnp.dot(ctx_h, wo_l[h * Dh:(h + 1) * Dh, :],
                                  preferred_element_type=f32)
        attn = attn + bo_ref[l]
        x = layernorm(attn + x, ln1_g_ref[l], ln1_b_ref[l])

        # feed-forward
        hmid = jnp.dot(x.astype(bf16), w1_ref[l],
                       preferred_element_type=f32) + b1_ref[l]
        # TODO(synk): HF BERT uses exact (erf) GELU; tanh approximation used here.
        hmid = jax.nn.gelu(hmid, approximate=True)
        ffn = jnp.dot(hmid.astype(bf16), w2_ref[l],
                      preferred_element_type=f32) + b2_ref[l]
        x = layernorm(ffn + x, ln2_g_ref[l], ln2_b_ref[l])

    # ---------- pooler on [CLS] + IR classifier + sigmoid (padded rows) -----
    # select CLS rows (index b*S) with a tiny selection matmul -> [row_pad, H]
    r = jax.lax.broadcasted_iota(jnp.int32, (row_pad, BS), 0)
    c = jax.lax.broadcasted_iota(jnp.int32, (row_pad, BS), 1)
    sel = ((c == r * S) & (r < B)).astype(f32)
    cls_tok = jnp.dot(sel, x, preferred_element_type=f32)               # [row_pad,H]

    pooled = jnp.tanh(jnp.dot(cls_tok.astype(bf16), pool_w_ref[...],
                              preferred_element_type=f32) + pool_b_ref[...])
    logits = jnp.dot(pooled.astype(bf16), cls_w_ref[...],
                     preferred_element_type=f32) + cls_b_ref[...]       # [row_pad,128]
    # sigmoid written out explicitly (exp lands on the EUP slot)
    out_ref[...] = 1.0 / (1.0 + jnp.exp(-logits))                       # dense store


# ------------------------------ param packing -------------------------------

def pack_params(params):
    """Stack per-layer weights along a layer axis, fuse QKV into one [H, 3H]
    bf16 weight with 1/sqrt(Dh) folded into the Q slice, cast all matmul
    weights to bf16, and pad the IR classifier to a lane-dense 128 output."""
    H = CFG["hidden"]
    scale = 1.0 / math.sqrt(CFG["head_dim"])
    bf16 = jnp.bfloat16

    def stack(fn):
        return jnp.stack([fn(l) for l in params["layers"]])

    return dict(
        word_emb=params["word_emb"],
        pos_emb=params["pos_emb"],
        type_emb=params["type_emb"],
        emb_ln_g=params["emb_ln_g"].reshape(1, H),
        emb_ln_b=params["emb_ln_b"].reshape(1, H),
        wqkv=stack(lambda l: jnp.concatenate(
            [l["wq"] * scale, l["wk"], l["wv"]], axis=1)).astype(bf16),   # [L,H,3H]
        bqkv=stack(lambda l: jnp.concatenate(
            [l["bq"] * scale, l["bk"], l["bv"]]).reshape(1, 3 * H)),      # [L,1,3H]
        wo=stack(lambda l: l["wo"]).astype(bf16),
        bo=stack(lambda l: l["bo"].reshape(1, H)),
        ln1_g=stack(lambda l: l["ln1_g"].reshape(1, H)),
        ln1_b=stack(lambda l: l["ln1_b"].reshape(1, H)),
        w1=stack(lambda l: l["w1"]).astype(bf16),
        b1=stack(lambda l: l["b1"].reshape(1, -1)),
        w2=stack(lambda l: l["w2"]).astype(bf16),
        b2=stack(lambda l: l["b2"].reshape(1, H)),
        ln2_g=stack(lambda l: l["ln2_g"].reshape(1, H)),
        ln2_b=stack(lambda l: l["ln2_b"].reshape(1, H)),
        pool_w=params["pool_w"].astype(bf16),
        pool_b=params["pool_b"].reshape(1, H),
        cls_w=jnp.pad(params["cls_w"],
                      ((0, 0), (0, OUT_PAD - NUM_LABELS))).astype(bf16),
        cls_b=jnp.pad(params["cls_b"],
                      (0, OUT_PAD - NUM_LABELS)).reshape(1, OUT_PAD),
    )


# ------------------------------ model forward --------------------------------

@jax.jit
def bert_ir_forward(packed, input_ids, attention_mask, token_type_ids=None):
    B, S = input_ids.shape
    H, nH, Dh = CFG["hidden"], CFG["heads"], CFG["head_dim"]
    L, V, I = CFG["layers"], CFG["vocab"], CFG["intermediate"]
    if token_type_ids is None:
        token_type_ids = jnp.zeros_like(input_ids)

    BS = B * S
    ROW_PAD = max(8, ((B + 7) // 8) * 8)

    # only trivial reshapes/casts remain outside the kernel
    ids = input_ids.astype(jnp.int32).reshape(BS, 1)
    tts = token_type_ids.astype(jnp.int32).reshape(BS, 1)
    amask = attention_mask.astype(jnp.int32)

    kernel_inputs = (
        ids, tts, amask,
        packed["word_emb"], packed["pos_emb"], packed["type_emb"],
        packed["emb_ln_g"], packed["emb_ln_b"],
        packed["wqkv"], packed["bqkv"], packed["wo"], packed["bo"],
        packed["ln1_g"], packed["ln1_b"],
        packed["w1"], packed["b1"], packed["w2"], packed["b2"],
        packed["ln2_g"], packed["ln2_b"],
        packed["pool_w"], packed["pool_b"], packed["cls_w"], packed["cls_b"],
    )

    # advisory cost estimate (MACs * 2, rough transcendental count, bytes)
    flops = 2 * BS * V * H                                           # one-hot gather
    flops += L * (2 * BS * H * 3 * H                                 # QKV proj
                  + 2 * 2 * (nH * B) * S * S * Dh                    # QK^T + P@V
                  + 2 * BS * H * H                                   # W_o
                  + 2 * 2 * BS * H * I)                              # FFN
    flops += 2 * ROW_PAD * BS * H + 2 * ROW_PAD * H * H + 2 * ROW_PAD * H * OUT_PAD
    trans = L * ((nH * B) * S * S + BS * I) + ROW_PAD * H + ROW_PAD * OUT_PAD
    bytes_accessed = (sum(int(a.size) * a.dtype.itemsize for a in kernel_inputs)
                      + ROW_PAD * OUT_PAD * 4)

    kern = functools.partial(_bert_forward_kernel,
                             num_layers=L, B=B, S=S, nH=nH, Dh=Dh,
                             row_pad=ROW_PAD, eps=1e-12)
    prob_pad = pl.pallas_call(
        kern,
        out_shape=jax.ShapeDtypeStruct((ROW_PAD, OUT_PAD), jnp.float32),
        grid=(1,),
        in_specs=[_full_spec(a.shape) for a in kernel_inputs],
        out_specs=_full_spec((ROW_PAD, OUT_PAD)),
        compiler_params=pltpu.CompilerParams(dimension_semantics=("arbitrary",)),
        cost_estimate=pl.CostEstimate(flops=flops, transcendentals=trans,
                                      bytes_accessed=bytes_accessed),
    )(*kernel_inputs)

    # num_labels=2 => torch.sigmoid(logits.squeeze(-1)) keeps shape [B, 2]
    return prob_pad[:B, :NUM_LABELS]


# ------------------------------ param init ----------------------------------

def init_params(key):
    H, I = CFG["hidden"], CFG["intermediate"]
    keys = jax.random.split(key, 8 + CFG["layers"] * 8)
    it = iter(keys)

    def normal(shape, k, scale=0.02):
        return scale * jax.random.normal(k, shape, jnp.float32)

    params = dict(
        word_emb=normal((CFG["vocab"], H), next(it)),
        pos_emb=normal((CFG["max_pos"], H), next(it)),
        type_emb=normal((CFG["type_vocab"], H), next(it)),
        emb_ln_g=jnp.ones((H,), jnp.float32),
        emb_ln_b=jnp.zeros((H,), jnp.float32),
        pool_w=normal((H, H), next(it)),
        pool_b=jnp.zeros((H,), jnp.float32),
    )
    # nn.init.xavier_uniform_ for the IR classification layer
    fan_in, fan_out = H, NUM_LABELS
    bound = math.sqrt(6.0 / (fan_in + fan_out))
    params["cls_w"] = jax.random.uniform(next(it), (H, NUM_LABELS),
                                         jnp.float32, -bound, bound)
    params["cls_b"] = jnp.zeros((NUM_LABELS,), jnp.float32)

    layers = []
    for _ in range(CFG["layers"]):
        layers.append(dict(
            wq=normal((H, H), next(it)), bq=jnp.zeros((H,), jnp.float32),
            wk=normal((H, H), next(it)), bk=jnp.zeros((H,), jnp.float32),
            wv=normal((H, H), next(it)), bv=jnp.zeros((H,), jnp.float32),
            wo=normal((H, H), next(it)), bo=jnp.zeros((H,), jnp.float32),
            ln1_g=jnp.ones((H,), jnp.float32), ln1_b=jnp.zeros((H,), jnp.float32),
            w1=normal((H, I), next(it)), b1=jnp.zeros((I,), jnp.float32),
            w2=normal((I, H), next(it)), b2=jnp.zeros((H,), jnp.float32),
            ln2_g=jnp.ones((H,), jnp.float32), ln2_b=jnp.zeros((H,), jnp.float32),
        ))
    params["layers"] = layers
    return params


# ---------------------------------- main -------------------------------------

if __name__ == "__main__":
    key = jax.random.PRNGKey(0)
    pkey, ikey = jax.random.split(key)
    params = init_params(pkey)
    packed = pack_params(params)

    B, S = 2, 8
    input_ids = jax.random.randint(ikey, (B, S), 0, CFG["vocab"], dtype=jnp.int32)
    attention_mask = jnp.ones((B, S), jnp.int32).at[1, 6:].set(0)  # padded tail
    token_type_ids = jnp.zeros((B, S), jnp.int32)

    prob = bert_ir_forward(packed, input_ids, attention_mask, token_type_ids)
    prob = jax.block_until_ready(prob)
    assert prob.shape == (B, NUM_LABELS)
    assert bool(jnp.all(jnp.isfinite(prob)))
    assert bool(jnp.all((prob >= 0.0) & (prob <= 1.0)))
    print("KERNEL_OK")
</pallas_src>

<mosaic_0001>
module attributes {stable_mosaic.version = 11 : i64} {
  func.func @_bert_forward_kernel(%arg0: i32, %arg1: memref<16x1xi32, #tpu.memory_space<vmem>>, %arg2: memref<16x1xi32, #tpu.memory_space<vmem>>, %arg3: memref<2x8xi32, #tpu.memory_space<vmem>>, %arg4: memref<100x32xf32, #tpu.memory_space<vmem>>, %arg5: memref<16x32xf32, #tpu.memory_space<vmem>>, %arg6: memref<2x32xf32, #tpu.memory_space<vmem>>, %arg7: memref<1x32xf32, #tpu.memory_space<vmem>>, %arg8: memref<1x32xf32, #tpu.memory_space<vmem>>, %arg9: memref<2x32x96xbf16, #tpu.memory_space<vmem>>, %arg10: memref<2x1x96xf32, #tpu.memory_space<vmem>>, %arg11: memref<2x32x32xbf16, #tpu.memory_space<vmem>>, %arg12: memref<2x1x32xf32, #tpu.memory_space<vmem>>, %arg13: memref<2x1x32xf32, #tpu.memory_space<vmem>>, %arg14: memref<2x1x32xf32, #tpu.memory_space<vmem>>, %arg15: memref<2x32x64xbf16, #tpu.memory_space<vmem>>, %arg16: memref<2x1x64xf32, #tpu.memory_space<vmem>>, %arg17: memref<2x64x32xbf16, #tpu.memory_space<vmem>>, %arg18: memref<2x1x32xf32, #tpu.memory_space<vmem>>, %arg19: memref<2x1x32xf32, #tpu.memory_space<vmem>>, %arg20: memref<2x1x32xf32, #tpu.memory_space<vmem>>, %arg21: memref<32x32xbf16, #tpu.memory_space<vmem>>, %arg22: memref<1x32xf32, #tpu.memory_space<vmem>>, %arg23: memref<32x128xbf16, #tpu.memory_space<vmem>>, %arg24: memref<1x128xf32, #tpu.memory_space<vmem>>, %arg25: memref<8x128xf32, #tpu.memory_space<vmem>>) attributes {dimension_semantics = [#tpu.dimension_semantics<arbitrary>], iteration_bounds = array<i64: 1>, scalar_prefetch = 0 : i64, scratch_operands = 0 : i64, tpu.core_type = #tpu.core_type<tc>, window_params = [{pipeline_mode = #tpu.pipeline_mode<synchronous>, transform_indices = @transform_0, window_bounds = array<i64: 16, 1>}, {pipeline_mode = #tpu.pipeline_mode<synchronous>, transform_indices = @transform_1, window_bounds = array<i64: 16, 1>}, {pipeline_mode = #tpu.pipeline_mode<synchronous>, transform_indices = @transform_2, window_bounds = array<i64: 2, 8>}, {pipeline_mode = #tpu.pipeline_mode<synchronous>, transform_indices = @transform_3, window_bounds = array<i64: 100, 32>}, {pipeline_mode = #tpu.pipeline_mode<synchronous>, transform_indices = @transform_4, window_bounds = array<i64: 16, 32>}, {pipeline_mode = #tpu.pipeline_mode<synchronous>, transform_indices = @transform_5, window_bounds = array<i64: 2, 32>}, {pipeline_mode = #tpu.pipeline_mode<synchronous>, transform_indices = @transform_6, window_bounds = array<i64: 1, 32>}, {pipeline_mode = #tpu.pipeline_mode<synchronous>, transform_indices = @transform_7, window_bounds = array<i64: 1, 32>}, {pipeline_mode = #tpu.pipeline_mode<synchronous>, transform_indices = @transform_8, window_bounds = array<i64: 2, 32, 96>}, {pipeline_mode = #tpu.pipeline_mode<synchronous>, transform_indices = @transform_9, window_bounds = array<i64: 2, 1, 96>}, {pipeline_mode = #tpu.pipeline_mode<synchronous>, transform_indices = @transform_10, window_bounds = array<i64: 2, 32, 32>}, {pipeline_mode = #tpu.pipeline_mode<synchronous>, transform_indices = @transform_11, window_bounds = array<i64: 2, 1, 32>}, {pipeline_mode = #tpu.pipeline_mode<synchronous>, transform_indices = @transform_12, window_bounds = array<i64: 2, 1, 32>}, {pipeline_mode = #tpu.pipeline_mode<synchronous>, transform_indices = @transform_13, window_bounds = array<i64: 2, 1, 32>}, {pipeline_mode = #tpu.pipeline_mode<synchronous>, transform_indices = @transform_14, window_bounds = array<i64: 2, 32, 64>}, {pipeline_mode = #tpu.pipeline_mode<synchronous>, transform_indices = @transform_15, window_bounds = array<i64: 2, 1, 64>}, {pipeline_mode = #tpu.pipeline_mode<synchronous>, transform_indices = @transform_16, window_bounds = array<i64: 2, 64, 32>}, {pipeline_mode = #tpu.pipeline_mode<synchronous>, transform_indices = @transform_17, window_bounds = array<i64: 2, 1, 32>}, {pipeline_mode = #tpu.pipeline_mode<synchronous>, transform_indices = @transform_18, window_bounds = array<i64: 2, 1, 32>}, {pipeline_mode = #tpu.pipeline_mode<synchronous>, transform_indices = @transform_19, window_bounds = array<i64: 2, 1, 32>}, {pipeline_mode = #tpu.pipeline_mode<synchronous>, transform_indices = @transform_20, window_bounds = array<i64: 32, 32>}, {pipeline_mode = #tpu.pipeline_mode<synchronous>, transform_indices = @transform_21, window_bounds = array<i64: 1, 32>}, {pipeline_mode = #tpu.pipeline_mode<synchronous>, transform_indices = @transform_22, window_bounds = array<i64: 32, 128>}, {pipeline_mode = #tpu.pipeline_mode<synchronous>, transform_indices = @transform_23, window_bounds = array<i64: 1, 128>}, {pipeline_mode = #tpu.pipeline_mode<synchronous>, transform_indices = @transform_24, window_bounds = array<i64: 8, 128>}]} {
    %c0 = arith.constant 0 : index
    %c0_0 = arith.constant 0 : index
    %0 = vector.load %arg1[%c0, %c0_0] : memref<16x1xi32, #tpu.memory_space<vmem>>, vector<16x1xi32>
    %1 = tpu.iota {dimensions = array<i32: 1>} : vector<16x100xi32>
    %2 = vector.broadcast %0 : vector<16x1xi32> to vector<16x100xi32>
    %3 = arith.cmpi eq, %2, %1 : vector<16x100xi32>
    %4 = arith.extui %3 : vector<16x100xi1> to vector<16x100xi32>
    %5 = arith.sitofp %4 : vector<16x100xi32> to vector<16x100xf32>
    %c0_1 = arith.constant 0 : index
    %c0_2 = arith.constant 0 : index
    %6 = vector.load %arg4[%c0_1, %c0_2] : memref<100x32xf32, #tpu.memory_space<vmem>>, vector<100x32xf32>
    %cst = arith.constant dense<0.000000e+00> : vector<16x32xf32>
    %7 = tpu.matmul %5, %6, %cst {dimension_numbers = #tpu.dot_dimension_numbers<[1], [0], [0], [1], [0, 0, 1, 1], [], []>} : vector<16x100xf32>, vector<100x32xf32>, vector<16x32xf32> -> vector<16x32xf32>
    %c0_3 = arith.constant 0 : index
    %c0_4 = arith.constant 0 : index
    %8 = vector.load %arg5[%c0_3, %c0_4] : memref<16x32xf32, #tpu.memory_space<vmem>>, vector<8x32xf32>
    %9 = vector.shape_cast %8 : vector<8x32xf32> to vector<1x8x32xf32>
    %10 = vector.shape_cast %9 : vector<1x8x32xf32> to vector<1x8x32xf32>
    %11 = vector.broadcast %10 : vector<1x8x32xf32> to vector<2x8x32xf32>
    %12 = vector.shape_cast %11 : vector<2x8x32xf32> to vector<16x32xf32>
    %c0_5 = arith.constant 0 : index
    %c0_6 = arith.constant 0 : index
    %13 = vector.load %arg2[%c0_5, %c0_6] : memref<16x1xi32, #tpu.memory_space<vmem>>, vector<16x1xi32>
    %c0_i32 = arith.constant 0 : i32
    %14 = vector.broadcast %c0_i32 : i32 to vector<16x1xi32>
    %15 = arith.cmpi eq, %13, %14 : vector<16x1xi32>
    %c0_7 = arith.constant 0 : index
    %c0_8 = arith.constant 0 : index
    %16 = vector.load %arg6[%c0_7, %c0_8] : memref<2x32xf32, #tpu.memory_space<vmem>>, vector<1x32xf32>
    %c1 = arith.constant 1 : index
    %c0_9 = arith.constant 0 : index
    %17 = vector.load %arg6[%c1, %c0_9] : memref<2x32xf32, #tpu.memory_space<vmem>>, vector<1x32xf32>
    %18 = vector.shape_cast %15 : vector<16x1xi1> to vector<16x1xi1>
    %19 = vector.broadcast %18 : vector<16x1xi1> to vector<16x32xi1>
    %20 = vector.shape_cast %16 : vector<1x32xf32> to vector<1x32xf32>
    %21 = vector.broadcast %20 : vector<1x32xf32> to vector<16x32xf32>
    %22 = vector.shape_cast %17 : vector<1x32xf32> to vector<1x32xf32>
    %23 = vector.broadcast %22 : vector<1x32xf32> to vector<16x32xf32>
    %24 = arith.select %19, %21, %23 : vector<16x32xi1>, vector<16x32xf32>
    %25 = arith.addf %7, %12 : vector<16x32xf32>
    %26 = arith.addf %25, %24 : vector<16x32xf32>
    %c0_10 = arith.constant 0 : index
    %c0_11 = arith.constant 0 : index
    %27 = vector.load %arg7[%c0_10, %c0_11] : memref<1x32xf32, #tpu.memory_space<vmem>>, vector<1x32xf32>
    %c0_12 = arith.constant 0 : index
    %c0_13 = arith.constant 0 : index
    %28 = vector.load %arg8[%c0_12, %c0_13] : memref<1x32xf32, #tpu.memory_space<vmem>>, vector<1x32xf32>
    %cst_14 = arith.constant dense<0.000000e+00> : vector<16xf32>
    %29 = vector.multi_reduction <add>, %26, %cst_14 [1] : vector<16x32xf32> to vector<16xf32>
    %30 = vector.shape_cast %29 : vector<16xf32> to vector<16x1xf32>
    %cst_15 = arith.constant 3.200000e+01 : f32
    %31 = vector.broadcast %cst_15 : f32 to vector<16x1xf32>
    %32 = arith.divf %30, %31 : vector<16x1xf32>
    %33 = vector.broadcast %32 : vector<16x1xf32> to vector<16x32xf32>
    %34 = arith.subf %26, %33 : vector<16x32xf32>
    %35 = arith.mulf %34, %34 : vector<16x32xf32>
    %cst_16 = arith.constant dense<0.000000e+00> : vector<16xf32>
    %36 = vector.multi_reduction <add>, %35, %cst_16 [1] : vector<16x32xf32> to vector<16xf32>
    %37 = vector.shape_cast %36 : vector<16xf32> to vector<16x1xf32>
    %cst_17 = arith.constant 3.200000e+01 : f32
    %38 = vector.broadcast %cst_17 : f32 to vector<16x1xf32>
    %39 = arith.divf %37, %38 : vector<16x1xf32>
    %40 = vector.broadcast %32 : vector<16x1xf32> to vector<16x32xf32>
    %41 = arith.subf %26, %40 : vector<16x32xf32>
    %cst_18 = arith.constant 9.99999996E-13 : f32
    %42 = vector.broadcast %cst_18 : f32 to vector<16x1xf32>
    %43 = arith.addf %39, %42 : vector<16x1xf32>
    %44 = math.rsqrt %43 : vector<16x1xf32>
    %45 = vector.broadcast %44 : vector<16x1xf32> to vector<16x32xf32>
    %46 = arith.mulf %41, %45 : vector<16x32xf32>
    %47 = vector.broadcast %27 : vector<1x32xf32> to vector<16x32xf32>
    %48 = arith.mulf %46, %47 : vector<16x32xf32>
    %49 = vector.broadcast %28 : vector<1x32xf32> to vector<16x32xf32>
    %50 = arith.addf %48, %49 : vector<16x32xf32>
    %c0_19 = arith.constant 0 : index
    %c0_20 = arith.constant 0 : index
    %51 = vector.load %arg3[%c0_19, %c0_20] : memref<2x8xi32, #tpu.memory_space<vmem>>, vector<2x8xi32>
    %52 = arith.sitofp %51 : vector<2x8xi32> to vector<2x8xf32>
    %cst_21 = arith.constant 1.000000e+00 : f32
    %53 = vector.broadcast %cst_21 : f32 to vector<2x8xf32>
    %54 = arith.subf %53, %52 : vector<2x8xf32>
    %cst_22 = arith.constant -1.000000e+09 : f32
    %55 = vector.broadcast %cst_22 : f32 to vector<2x8xf32>
    %56 = arith.mulf %54, %55 : vector<2x8xf32>
    %57 = vector.shape_cast %56 : vector<2x8xf32> to vector<2x1x8xf32>
    %58 = vector.shape_cast %57 : vector<2x1x8xf32> to vector<2x1x8xf32>
    %59 = vector.broadcast %58 : vector<2x1x8xf32> to vector<2x8x8xf32>
    %60 = tpu.concatenate %59, %59 in 0 : vector<2x8x8xf32>, vector<2x8x8xf32> -> vector<4x8x8xf32>
    %61 = arith.truncf %50 : vector<16x32xf32> to vector<16x32xbf16>
    %c0_23 = arith.constant 0 : index
    %c0_24 = arith.constant 0 : index
    %c0_25 = arith.constant 0 : index
    %62 = vector.load %arg9[%c0_23, %c0_24, %c0_25] : memref<2x32x96xbf16, #tpu.memory_space<vmem>>, vector<1x32x96xbf16>
    %63 = vector.shape_cast %62 : vector<1x32x96xbf16> to vector<32x96xbf16>
    %cst_26 = arith.constant dense<0.000000e+00> : vector<16x96xf32>
    %64 = tpu.matmul %61, %63, %cst_26 {dimension_numbers = #tpu.dot_dimension_numbers<[1], [0], [0], [1], [0, 0, 1, 1], [], []>} : vector<16x32xbf16>, vector<32x96xbf16>, vector<16x96xf32> -> vector<16x96xf32>
    %c0_27 = arith.constant 0 : index
    %c0_28 = arith.constant 0 : index
    %c0_29 = arith.constant 0 : index
    %65 = vector.load %arg10[%c0_27, %c0_28, %c0_29] : memref<2x1x96xf32, #tpu.memory_space<vmem>>, vector<1x1x96xf32>
    %66 = vector.shape_cast %65 : vector<1x1x96xf32> to vector<1x96xf32>
    %67 = vector.broadcast %66 : vector<1x96xf32> to vector<16x96xf32>
    %68 = arith.addf %64, %67 : vector<16x96xf32>
    %69 = vector.extract_strided_slice %68 {offsets = [0, 0], sizes = [16, 16], strides = [1, 1]} : vector<16x96xf32> to vector<16x16xf32>
    %70 = vector.shape_cast %69 : vector<16x16xf32> to vector<2x8x16xf32>
    %71 = vector.extract_strided_slice %68 {offsets = [0, 16], sizes = [16, 16], strides = [1, 1]} : vector<16x96xf32> to vector<16x16xf32>
    %72 = vector.shape_cast %71 : vector<16x16xf32> to vector<2x8x16xf32>
    %73 = tpu.concatenate %70, %72 in 0 : vector<2x8x16xf32>, vector<2x8x16xf32> -> vector<4x8x16xf32>
    %74 = arith.truncf %73 : vector<4x8x16xf32> to vector<4x8x16xbf16>
    %75 = vector.extract_strided_slice %68 {offsets = [0, 32], sizes = [16, 16], strides = [1, 1]} : vector<16x96xf32> to vector<16x16xf32>
    %76 = vector.shape_cast %75 : vector<16x16xf32> to vector<2x8x16xf32>
    %77 = vector.extract_strided_slice %68 {offsets = [0, 48], sizes = [16, 16], strides = [1, 1]} : vector<16x96xf32> to vector<16x16xf32>
    %78 = vector.shape_cast %77 : vector<16x16xf32> to vector<2x8x16xf32>
    %79 = tpu.concatenate %76, %78 in 0 : vector<2x8x16xf32>, vector<2x8x16xf32> -> vector<4x8x16xf32>
    %80 = arith.truncf %79 : vector<4x8x16xf32> to vector<4x8x16xbf16>
    %81 = vector.extract_strided_slice %68 {offsets = [0, 64], sizes = [16, 16], strides = [1, 1]} : vector<16x96xf32> to vector<16x16xf32>
    %82 = vector.shape_cast %81 : vector<16x16xf32> to vector<2x8x16xf32>
    %83 = vector.extract_strided_slice %68 {offsets = [0, 80], sizes = [16, 16], strides = [1, 1]} : vector<16x96xf32> to vector<16x16xf32>
    %84 = vector.shape_cast %83 : vector<16x16xf32> to vector<2x8x16xf32>
    %85 = tpu.concatenate %82, %84 in 0 : vector<2x8x16xf32>, vector<2x8x16xf32> -> vector<4x8x16xf32>
    %86 = arith.truncf %85 : vector<4x8x16xf32> to vector<4x8x16xbf16>
    "tpu.trace_start"() <{level = 10 : i32, message = "bqd,bkd->bqk"}> : () -> ()
    %cst_30 = arith.constant dense<0.000000e+00> : vector<4x8x8xf32>
    %87 = tpu.matmul %74, %80, %cst_30 {dimension_numbers = #tpu.dot_dimension_numbers<[2], [2], [1], [1], [0, 0, 0, 1, 1, 1], [0], [0]>} : vector<4x8x16xbf16>, vector<4x8x16xbf16>, vector<4x8x8xf32> -> vector<4x8x8xf32>
    "tpu.trace_stop"() : () -> ()
    %88 = arith.addf %87, %60 : vector<4x8x8xf32>
    %cst_31 = arith.constant dense<0xFF800000> : vector<4x8xf32>
    %89 = vector.multi_reduction <maximumf>, %88, %cst_31 [2] : vector<4x8x8xf32> to vector<4x8xf32>
    %90 = vector.shape_cast %89 : vector<4x8xf32> to vector<4x8x1xf32>
    %91 = vector.broadcast %90 : vector<4x8x1xf32> to vector<4x8x8xf32>
    %92 = arith.subf %88, %91 : vector<4x8x8xf32>
    %93 = math.exp %92 : vector<4x8x8xf32>
    %cst_32 = arith.constant dense<0.000000e+00> : vector<4x8xf32>
    %94 = vector.multi_reduction <add>, %93, %cst_32 [2] : vector<4x8x8xf32> to vector<4x8xf32>
    %95 = vector.shape_cast %94 : vector<4x8xf32> to vector<4x8x1xf32>
    %96 = tpu.reciprocal %95 {approx = true} : vector<4x8x1xf32> -> vector<4x8x1xf32>
    %97 = vector.broadcast %96 : vector<4x8x1xf32> to vector<4x8x8xf32>
    %98 = arith.mulf %93, %97 : vector<4x8x8xf32>
    %99 = arith.truncf %98 : vector<4x8x8xf32> to vector<4x8x8xbf16>
    "tpu.trace_start"() <{level = 10 : i32, message = "bqk,bkd->bqd"}> : () -> ()
    %cst_33 = arith.constant dense<0.000000e+00> : vector<4x8x16xf32>
    %100 = tpu.matmul %99, %86, %cst_33 {dimension_numbers = #tpu.dot_dimension_numbers<[2], [1], [1], [2], [0, 0, 0, 1, 1, 2], [0], [0]>} : vector<4x8x8xbf16>, vector<4x8x16xbf16>, vector<4x8x16xf32> -> vector<4x8x16xf32>
    "tpu.trace_stop"() : () -> ()
    %c0_34 = arith.constant 0 : index
    %c0_35 = arith.constant 0 : index
    %c0_36 = arith.constant 0 : index
    %101 = vector.load %arg11[%c0_34, %c0_35, %c0_36] : memref<2x32x32xbf16, #tpu.memory_space<vmem>>, vector<1x32x32xbf16>
    %102 = vector.shape_cast %101 : vector<1x32x32xbf16> to vector<32x32xbf16>
    %cst_37 = arith.constant 0.000000e+00 : f32
    %103 = vector.broadcast %cst_37 : f32 to vector<16x32xf32>
    %104 = vector.extract_strided_slice %100 {offsets = [0, 0, 0], sizes = [2, 8, 16], strides = [1, 1, 1]} : vector<4x8x16xf32> to vector<2x8x16xf32>
    %105 = vector.shape_cast %104 : vector<2x8x16xf32> to vector<16x16xf32>
    %106 = arith.truncf %105 : vector<16x16xf32> to vector<16x16xbf16>
    %107 = vector.extract_strided_slice %102 {offsets = [0, 0], sizes = [16, 32], strides = [1, 1]} : vector<32x32xbf16> to vector<16x32xbf16>
    %cst_38 = arith.constant dense<0.000000e+00> : vector<16x32xf32>
    %108 = tpu.matmul %106, %107, %cst_38 {dimension_numbers = #tpu.dot_dimension_numbers<[1], [0], [0], [1], [0, 0, 1, 1], [], []>} : vector<16x16xbf16>, vector<16x32xbf16>, vector<16x32xf32> -> vector<16x32xf32>
    %109 = arith.addf %103, %108 : vector<16x32xf32>
    %110 = vector.extract_strided_slice %100 {offsets = [2, 0, 0], sizes = [2, 8, 16], strides = [1, 1, 1]} : vector<4x8x16xf32> to vector<2x8x16xf32>
    %111 = vector.shape_cast %110 : vector<2x8x16xf32> to vector<16x16xf32>
    %112 = arith.truncf %111 : vector<16x16xf32> to vector<16x16xbf16>
    %113 = vector.extract_strided_slice %102 {offsets = [16, 0], sizes = [16, 32], strides = [1, 1]} : vector<32x32xbf16> to vector<16x32xbf16>
    %cst_39 = arith.constant dense<0.000000e+00> : vector<16x32xf32>
    %114 = tpu.matmul %112, %113, %cst_39 {dimension_numbers = #tpu.dot_dimension_numbers<[1], [0], [0], [1], [0, 0, 1, 1], [], []>} : vector<16x16xbf16>, vector<16x32xbf16>, vector<16x32xf32> -> vector<16x32xf32>
    %115 = arith.addf %109, %114 : vector<16x32xf32>
    %c0_40 = arith.constant 0 : index
    %c0_41 = arith.constant 0 : index
    %c0_42 = arith.constant 0 : index
    %116 = vector.load %arg12[%c0_40, %c0_41, %c0_42] : memref<2x1x32xf32, #tpu.memory_space<vmem>>, vector<1x1x32xf32>
    %117 = vector.shape_cast %116 : vector<1x1x32xf32> to vector<1x32xf32>
    %118 = vector.broadcast %117 : vector<1x32xf32> to vector<16x32xf32>
    %119 = arith.addf %115, %118 : vector<16x32xf32>
    %120 = arith.addf %119, %50 : vector<16x32xf32>
    %c0_43 = arith.constant 0 : index
    %c0_44 = arith.constant 0 : index
    %c0_45 = arith.constant 0 : index
    %121 = vector.load %arg13[%c0_43, %c0_44, %c0_45] : memref<2x1x32xf32, #tpu.memory_space<vmem>>, vector<1x1x32xf32>
    %122 = vector.shape_cast %121 : vector<1x1x32xf32> to vector<1x32xf32>
    %c0_46 = arith.constant 0 : index
    %c0_47 = arith.constant 0 : index
    %c0_48 = arith.constant 0 : index
    %123 = vector.load %arg14[%c0_46, %c0_47, %c0_48] : memref<2x1x32xf32, #tpu.memory_space<vmem>>, vector<1x1x32xf32>
    %124 = vector.shape_cast %123 : vector<1x1x32xf32> to vector<1x32xf32>
    %cst_49 = arith.constant dense<0.000000e+00> : vector<16xf32>
    %125 = vector.multi_reduction <add>, %120, %cst_49 [1] : vector<16x32xf32> to vector<16xf32>
    %126 = vector.shape_cast %125 : vector<16xf32> to vector<16x1xf32>
    %cst_50 = arith.constant 3.200000e+01 : f32
    %127 = vector.broadcast %cst_50 : f32 to vector<16x1xf32>
    %128 = arith.divf %126, %127 : vector<16x1xf32>
    %129 = vector.broadcast %128 : vector<16x1xf32> to vector<16x32xf32>
    %130 = arith.subf %120, %129 : vector<16x32xf32>
    %131 = arith.mulf %130, %130 : vector<16x32xf32>
    %cst_51 = arith.constant dense<0.000000e+00> : vector<16xf32>
    %132 = vector.multi_reduction <add>, %131, %cst_51 [1] : vector<16x32xf32> to vector<16xf32>
    %133 = vector.shape_cast %132 : vector<16xf32> to vector<16x1xf32>
    %cst_52 = arith.constant 3.200000e+01 : f32
    %134 = vector.broadcast %cst_52 : f32 to vector<16x1xf32>
    %135 = arith.divf %133, %134 : vector<16x1xf32>
    %136 = vector.broadcast %128 : vector<16x1xf32> to vector<16x32xf32>
    %137 = arith.subf %120, %136 : vector<16x32xf32>
    %cst_53 = arith.constant 9.99999996E-13 : f32
    %138 = vector.broadcast %cst_53 : f32 to vector<16x1xf32>
    %139 = arith.addf %135, %138 : vector<16x1xf32>
    %140 = math.rsqrt %139 : vector<16x1xf32>
    %141 = vector.broadcast %140 : vector<16x1xf32> to vector<16x32xf32>
    %142 = arith.mulf %137, %141 : vector<16x32xf32>
    %143 = vector.broadcast %122 : vector<1x32xf32> to vector<16x32xf32>
    %144 = arith.mulf %142, %143 : vector<16x32xf32>
    %145 = vector.broadcast %124 : vector<1x32xf32> to vector<16x32xf32>
    %146 = arith.addf %144, %145 : vector<16x32xf32>
    %147 = arith.truncf %146 : vector<16x32xf32> to vector<16x32xbf16>
    %c0_54 = arith.constant 0 : index
    %c0_55 = arith.constant 0 : index
    %c0_56 = arith.constant 0 : index
    %148 = vector.load %arg15[%c0_54, %c0_55, %c0_56] : memref<2x32x64xbf16, #tpu.memory_space<vmem>>, vector<1x32x64xbf16>
    %149 = vector.shape_cast %148 : vector<1x32x64xbf16> to vector<32x64xbf16>
    %cst_57 = arith.constant dense<0.000000e+00> : vector<16x64xf32>
    %150 = tpu.matmul %147, %149, %cst_57 {dimension_numbers = #tpu.dot_dimension_numbers<[1], [0], [0], [1], [0, 0, 1, 1], [], []>} : vector<16x32xbf16>, vector<32x64xbf16>, vector<16x64xf32> -> vector<16x64xf32>
    %c0_58 = arith.constant 0 : index
    %c0_59 = arith.constant 0 : index
    %c0_60 = arith.constant 0 : index
    %151 = vector.load %arg16[%c0_58, %c0_59, %c0_60] : memref<2x1x64xf32, #tpu.memory_space<vmem>>, vector<1x1x64xf32>
    %152 = vector.shape_cast %151 : vector<1x1x64xf32> to vector<1x64xf32>
    %153 = vector.broadcast %152 : vector<1x64xf32> to vector<16x64xf32>
    %154 = arith.addf %150, %153 : vector<16x64xf32>
    %155 = arith.mulf %154, %154 : vector<16x64xf32>
    %156 = arith.mulf %154, %155 : vector<16x64xf32>
    %cst_61 = arith.constant 4.471500e-02 : f32
    %157 = vector.broadcast %cst_61 : f32 to vector<16x64xf32>
    %158 = arith.mulf %157, %156 : vector<16x64xf32>
    %159 = arith.addf %154, %158 : vector<16x64xf32>
    %cst_62 = arith.constant 0.797884583 : f32
    %160 = vector.broadcast %cst_62 : f32 to vector<16x64xf32>
    %161 = arith.mulf %160, %159 : vector<16x64xf32>
    %162 = math.tanh %161 : vector<16x64xf32>
    %cst_63 = arith.constant 1.000000e+00 : f32
    %163 = vector.broadcast %cst_63 : f32 to vector<16x64xf32>
    %164 = arith.addf %163, %162 : vector<16x64xf32>
    %cst_64 = arith.constant 5.000000e-01 : f32
    %165 = vector.broadcast %cst_64 : f32 to vector<16x64xf32>
    %166 = arith.mulf %165, %164 : vector<16x64xf32>
    %167 = arith.mulf %154, %166 : vector<16x64xf32>
    %168 = arith.truncf %167 : vector<16x64xf32> to vector<16x64xbf16>
    %c0_65 = arith.constant 0 : index
    %c0_66 = arith.constant 0 : index
    %c0_67 = arith.constant 0 : index
    %169 = vector.load %arg17[%c0_65, %c0_66, %c0_67] : memref<2x64x32xbf16, #tpu.memory_space<vmem>>, vector<1x64x32xbf16>
    %170 = vector.shape_cast %169 : vector<1x64x32xbf16> to vector<64x32xbf16>
    %cst_68 = arith.constant dense<0.000000e+00> : vector<16x32xf32>
    %171 = tpu.matmul %168, %170, %cst_68 {dimension_numbers = #tpu.dot_dimension_numbers<[1], [0], [0], [1], [0, 0, 1, 1], [], []>} : vector<16x64xbf16>, vector<64x32xbf16>, vector<16x32xf32> -> vector<16x32xf32>
    %c0_69 = arith.constant 0 : index
    %c0_70 = arith.constant 0 : index
    %c0_71 = arith.constant 0 : index
    %172 = vector.load %arg18[%c0_69, %c0_70, %c0_71] : memref<2x1x32xf32, #tpu.memory_space<vmem>>, vector<1x1x32xf32>
    %173 = vector.shape_cast %172 : vector<1x1x32xf32> to vector<1x32xf32>
    %174 = vector.broadcast %173 : vector<1x32xf32> to vector<16x32xf32>
    %175 = arith.addf %171, %174 : vector<16x32xf32>
    %176 = arith.addf %175, %146 : vector<16x32xf32>
    %c0_72 = arith.constant 0 : index
    %c0_73 = arith.constant 0 : index
    %c0_74 = arith.constant 0 : index
    %177 = vector.load %arg19[%c0_72, %c0_73, %c0_74] : memref<2x1x32xf32, #tpu.memory_space<vmem>>, vector<1x1x32xf32>
    %178 = vector.shape_cast %177 : vector<1x1x32xf32> to vector<1x32xf32>
    %c0_75 = arith.constant 0 : index
    %c0_76 = arith.constant 0 : index
    %c0_77 = arith.constant 0 : index
    %179 = vector.load %arg20[%c0_75, %c0_76, %c0_77] : memref<2x1x32xf32, #tpu.memory_space<vmem>>, vector<1x1x32xf32>
    %180 = vector.shape_cast %179 : vector<1x1x32xf32> to vector<1x32xf32>
    %cst_78 = arith.constant dense<0.000000e+00> : vector<16xf32>
    %181 = vector.multi_reduction <add>, %176, %cst_78 [1] : vector<16x32xf32> to vector<16xf32>
    %182 = vector.shape_cast %181 : vector<16xf32> to vector<16x1xf32>
    %cst_79 = arith.constant 3.200000e+01 : f32
    %183 = vector.broadcast %cst_79 : f32 to vector<16x1xf32>
    %184 = arith.divf %182, %183 : vector<16x1xf32>
    %185 = vector.broadcast %184 : vector<16x1xf32> to vector<16x32xf32>
    %186 = arith.subf %176, %185 : vector<16x32xf32>
    %187 = arith.mulf %186, %186 : vector<16x32xf32>
    %cst_80 = arith.constant dense<0.000000e+00> : vector<16xf32>
    %188 = vector.multi_reduction <add>, %187, %cst_80 [1] : vector<16x32xf32> to vector<16xf32>
    %189 = vector.shape_cast %188 : vector<16xf32> to vector<16x1xf32>
    %cst_81 = arith.constant 3.200000e+01 : f32
    %190 = vector.broadcast %cst_81 : f32 to vector<16x1xf32>
    %191 = arith.divf %189, %190 : vector<16x1xf32>
    %192 = vector.broadcast %184 : vector<16x1xf32> to vector<16x32xf32>
    %193 = arith.subf %176, %192 : vector<16x32xf32>
    %cst_82 = arith.constant 9.99999996E-13 : f32
    %194 = vector.broadcast %cst_82 : f32 to vector<16x1xf32>
    %195 = arith.addf %191, %194 : vector<16x1xf32>
    %196 = math.rsqrt %195 : vector<16x1xf32>
    %197 = vector.broadcast %196 : vector<16x1xf32> to vector<16x32xf32>
    %198 = arith.mulf %193, %197 : vector<16x32xf32>
    %199 = vector.broadcast %178 : vector<1x32xf32> to vector<16x32xf32>
    %200 = arith.mulf %198, %199 : vector<16x32xf32>
    %201 = vector.broadcast %180 : vector<1x32xf32> to vector<16x32xf32>
    %202 = arith.addf %200, %201 : vector<16x32xf32>
    %203 = arith.truncf %202 : vector<16x32xf32> to vector<16x32xbf16>
    %c1_83 = arith.constant 1 : index
    %c0_84 = arith.constant 0 : index
    %c0_85 = arith.constant 0 : index
    %204 = vector.load %arg9[%c1_83, %c0_84, %c0_85] : memref<2x32x96xbf16, #tpu.memory_space<vmem>>, vector<1x32x96xbf16>
    %205 = vector.shape_cast %204 : vector<1x32x96xbf16> to vector<32x96xbf16>
    %cst_86 = arith.constant dense<0.000000e+00> : vector<16x96xf32>
    %206 = tpu.matmul %203, %205, %cst_86 {dimension_numbers = #tpu.dot_dimension_numbers<[1], [0], [0], [1], [0, 0, 1, 1], [], []>} : vector<16x32xbf16>, vector<32x96xbf16>, vector<16x96xf32> -> vector<16x96xf32>
    %c1_87 = arith.constant 1 : index
    %c0_88 = arith.constant 0 : index
    %c0_89 = arith.constant 0 : index
    %207 = vector.load %arg10[%c1_87, %c0_88, %c0_89] : memref<2x1x96xf32, #tpu.memory_space<vmem>>, vector<1x1x96xf32>
    %208 = vector.shape_cast %207 : vector<1x1x96xf32> to vector<1x96xf32>
    %209 = vector.broadcast %208 : vector<1x96xf32> to vector<16x96xf32>
    %210 = arith.addf %206, %209 : vector<16x96xf32>
    %211 = vector.extract_strided_slice %210 {offsets = [0, 0], sizes = [16, 16], strides = [1, 1]} : vector<16x96xf32> to vector<16x16xf32>
    %212 = vector.shape_cast %211 : vector<16x16xf32> to vector<2x8x16xf32>
    %213 = vector.extract_strided_slice %210 {offsets = [0, 16], sizes = [16, 16], strides = [1, 1]} : vector<16x96xf32> to vector<16x16xf32>
    %214 = vector.shape_cast %213 : vector<16x16xf32> to vector<2x8x16xf32>
    %215 = tpu.concatenate %212, %214 in 0 : vector<2x8x16xf32>, vector<2x8x16xf32> -> vector<4x8x16xf32>
    %216 = arith.truncf %215 : vector<4x8x16xf32> to vector<4x8x16xbf16>
    %217 = vector.extract_strided_slice %210 {offsets = [0, 32], sizes = [16, 16], strides = [1, 1]} : vector<16x96xf32> to vector<16x16xf32>
    %218 = vector.shape_cast %217 : vector<16x16xf32> to vector<2x8x16xf32>
    %219 = vector.extract_strided_slice %210 {offsets = [0, 48], sizes = [16, 16], strides = [1, 1]} : vector<16x96xf32> to vector<16x16xf32>
    %220 = vector.shape_cast %219 : vector<16x16xf32> to vector<2x8x16xf32>
    %221 = tpu.concatenate %218, %220 in 0 : vector<2x8x16xf32>, vector<2x8x16xf32> -> vector<4x8x16xf32>
    %222 = arith.truncf %221 : vector<4x8x16xf32> to vector<4x8x16xbf16>
    %223 = vector.extract_strided_slice %210 {offsets = [0, 64], sizes = [16, 16], strides = [1, 1]} : vector<16x96xf32> to vector<16x16xf32>
    %224 = vector.shape_cast %223 : vector<16x16xf32> to vector<2x8x16xf32>
    %225 = vector.extract_strided_slice %210 {offsets = [0, 80], sizes = [16, 16], strides = [1, 1]} : vector<16x96xf32> to vector<16x16xf32>
    %226 = vector.shape_cast %225 : vector<16x16xf32> to vector<2x8x16xf32>
    %227 = tpu.concatenate %224, %226 in 0 : vector<2x8x16xf32>, vector<2x8x16xf32> -> vector<4x8x16xf32>
    %228 = arith.truncf %227 : vector<4x8x16xf32> to vector<4x8x16xbf16>
    "tpu.trace_start"() <{level = 10 : i32, message = "bqd,bkd->bqk"}> : () -> ()
    %cst_90 = arith.constant dense<0.000000e+00> : vector<4x8x8xf32>
    %229 = tpu.matmul %216, %222, %cst_90 {dimension_numbers = #tpu.dot_dimension_numbers<[2], [2], [1], [1], [0, 0, 0, 1, 1, 1], [0], [0]>} : vector<4x8x16xbf16>, vector<4x8x16xbf16>, vector<4x8x8xf32> -> vector<4x8x8xf32>
    "tpu.trace_stop"() : () -> ()
    %230 = arith.addf %229, %60 : vector<4x8x8xf32>
    %cst_91 = arith.constant dense<0xFF800000> : vector<4x8xf32>
    %231 = vector.multi_reduction <maximumf>, %230, %cst_91 [2] : vector<4x8x8xf32> to vector<4x8xf32>
    %232 = vector.shape_cast %231 : vector<4x8xf32> to vector<4x8x1xf32>
    %233 = vector.broadcast %232 : vector<4x8x1xf32> to vector<4x8x8xf32>
    %234 = arith.subf %230, %233 : vector<4x8x8xf32>
    %235 = math.exp %234 : vector<4x8x8xf32>
    %cst_92 = arith.constant dense<0.000000e+00> : vector<4x8xf32>
    %236 = vector.multi_reduction <add>, %235, %cst_92 [2] : vector<4x8x8xf32> to vector<4x8xf32>
    %237 = vector.shape_cast %236 : vector<4x8xf32> to vector<4x8x1xf32>
    %238 = tpu.reciprocal %237 {approx = true} : vector<4x8x1xf32> -> vector<4x8x1xf32>
    %239 = vector.broadcast %238 : vector<4x8x1xf32> to vector<4x8x8xf32>
    %240 = arith.mulf %235, %239 : vector<4x8x8xf32>
    %241 = arith.truncf %240 : vector<4x8x8xf32> to vector<4x8x8xbf16>
    "tpu.trace_start"() <{level = 10 : i32, message = "bqk,bkd->bqd"}> : () -> ()
    %cst_93 = arith.constant dense<0.000000e+00> : vector<4x8x16xf32>
    %242 = tpu.matmul %241, %228, %cst_93 {dimension_numbers = #tpu.dot_dimension_numbers<[2], [1], [1], [2], [0, 0, 0, 1, 1, 2], [0], [0]>} : vector<4x8x8xbf16>, vector<4x8x16xbf16>, vector<4x8x16xf32> -> vector<4x8x16xf32>
    "tpu.trace_stop"() : () -> ()
    %c1_94 = arith.constant 1 : index
    %c0_95 = arith.constant 0 : index
    %c0_96 = arith.constant 0 : index
    %243 = vector.load %arg11[%c1_94, %c0_95, %c0_96] : memref<2x32x32xbf16, #tpu.memory_space<vmem>>, vector<1x32x32xbf16>
    %244 = vector.shape_cast %243 : vector<1x32x32xbf16> to vector<32x32xbf16>
    %cst_97 = arith.constant 0.000000e+00 : f32
    %245 = vector.broadcast %cst_97 : f32 to vector<16x32xf32>
    %246 = vector.extract_strided_slice %242 {offsets = [0, 0, 0], sizes = [2, 8, 16], strides = [1, 1, 1]} : vector<4x8x16xf32> to vector<2x8x16xf32>
    %247 = vector.shape_cast %246 : vector<2x8x16xf32> to vector<16x16xf32>
    %248 = arith.truncf %247 : vector<16x16xf32> to vector<16x16xbf16>
    %249 = vector.extract_strided_slice %244 {offsets = [0, 0], sizes = [16, 32], strides = [1, 1]} : vector<32x32xbf16> to vector<16x32xbf16>
    %cst_98 = arith.constant dense<0.000000e+00> : vector<16x32xf32>
    %250 = tpu.matmul %248, %249, %cst_98 {dimension_numbers = #tpu.dot_dimension_numbers<[1], [0], [0], [1], [0, 0, 1, 1], [], []>} : vector<16x16xbf16>, vector<16x32xbf16>, vector<16x32xf32> -> vector<16x32xf32>
    %251 = arith.addf %245, %250 : vector<16x32xf32>
    %252 = vector.extract_strided_slice %242 {offsets = [2, 0, 0], sizes = [2, 8, 16], strides = [1, 1, 1]} : vector<4x8x16xf32> to vector<2x8x16xf32>
    %253 = vector.shape_cast %252 : vector<2x8x16xf32> to vector<16x16xf32>
    %254 = arith.truncf %253 : vector<16x16xf32> to vector<16x16xbf16>
    %255 = vector.extract_strided_slice %244 {offsets = [16, 0], sizes = [16, 32], strides = [1, 1]} : vector<32x32xbf16> to vector<16x32xbf16>
    %cst_99 = arith.constant dense<0.000000e+00> : vector<16x32xf32>
    %256 = tpu.matmul %254, %255, %cst_99 {dimension_numbers = #tpu.dot_dimension_numbers<[1], [0], [0], [1], [0, 0, 1, 1], [], []>} : vector<16x16xbf16>, vector<16x32xbf16>, vector<16x32xf32> -> vector<16x32xf32>
    %257 = arith.addf %251, %256 : vector<16x32xf32>
    %c1_100 = arith.constant 1 : index
    %c0_101 = arith.constant 0 : index
    %c0_102 = arith.constant 0 : index
    %258 = vector.load %arg12[%c1_100, %c0_101, %c0_102] : memref<2x1x32xf32, #tpu.memory_space<vmem>>, vector<1x1x32xf32>
    %259 = vector.shape_cast %258 : vector<1x1x32xf32> to vector<1x32xf32>
    %260 = vector.broadcast %259 : vector<1x32xf32> to vector<16x32xf32>
    %261 = arith.addf %257, %260 : vector<16x32xf32>
    %262 = arith.addf %261, %202 : vector<16x32xf32>
    %c1_103 = arith.constant 1 : index
    %c0_104 = arith.constant 0 : index
    %c0_105 = arith.constant 0 : index
    %263 = vector.load %arg13[%c1_103, %c0_104, %c0_105] : memref<2x1x32xf32, #tpu.memory_space<vmem>>, vector<1x1x32xf32>
    %264 = vector.shape_cast %263 : vector<1x1x32xf32> to vector<1x32xf32>
    %c1_106 = arith.constant 1 : index
    %c0_107 = arith.constant 0 : index
    %c0_108 = arith.constant 0 : index
    %265 = vector.load %arg14[%c1_106, %c0_107, %c0_108] : memref<2x1x32xf32, #tpu.memory_space<vmem>>, vector<1x1x32xf32>
    %266 = vector.shape_cast %265 : vector<1x1x32xf32> to vector<1x32xf32>
    %cst_109 = arith.constant dense<0.000000e+00> : vector<16xf32>
    %267 = vector.multi_reduction <add>, %262, %cst_109 [1] : vector<16x32xf32> to vector<16xf32>
    %268 = vector.shape_cast %267 : vector<16xf32> to vector<16x1xf32>
    %cst_110 = arith.constant 3.200000e+01 : f32
    %269 = vector.broadcast %cst_110 : f32 to vector<16x1xf32>
    %270 = arith.divf %268, %269 : vector<16x1xf32>
    %271 = vector.broadcast %270 : vector<16x1xf32> to vector<16x32xf32>
    %272 = arith.subf %262, %271 : vector<16x32xf32>
    %273 = arith.mulf %272, %272 : vector<16x32xf32>
    %cst_111 = arith.constant dense<0.000000e+00> : vector<16xf32>
    %274 = vector.multi_reduction <add>, %273, %cst_111 [1] : vector<16x32xf32> to vector<16xf32>
    %275 = vector.shape_cast %274 : vector<16xf32> to vector<16x1xf32>
    %cst_112 = arith.constant 3.200000e+01 : f32
    %276 = vector.broadcast %cst_112 : f32 to vector<16x1xf32>
    %277 = arith.divf %275, %276 : vector<16x1xf32>
    %278 = vector.broadcast %270 : vector<16x1xf32> to vector<16x32xf32>
    %279 = arith.subf %262, %278 : vector<16x32xf32>
    %cst_113 = arith.constant 9.99999996E-13 : f32
    %280 = vector.broadcast %cst_113 : f32 to vector<16x1xf32>
    %281 = arith.addf %277, %280 : vector<16x1xf32>
    %282 = math.rsqrt %281 : vector<16x1xf32>
    %283 = vector.broadcast %282 : vector<16x1xf32> to vector<16x32xf32>
    %284 = arith.mulf %279, %283 : vector<16x32xf32>
    %285 = vector.broadcast %264 : vector<1x32xf32> to vector<16x32xf32>
    %286 = arith.mulf %284, %285 : vector<16x32xf32>
    %287 = vector.broadcast %266 : vector<1x32xf32> to vector<16x32xf32>
    %288 = arith.addf %286, %287 : vector<16x32xf32>
    %289 = arith.truncf %288 : vector<16x32xf32> to vector<16x32xbf16>
    %c1_114 = arith.constant 1 : index
    %c0_115 = arith.constant 0 : index
    %c0_116 = arith.constant 0 : index
    %290 = vector.load %arg15[%c1_114, %c0_115, %c0_116] : memref<2x32x64xbf16, #tpu.memory_space<vmem>>, vector<1x32x64xbf16>
    %291 = vector.shape_cast %290 : vector<1x32x64xbf16> to vector<32x64xbf16>
    %cst_117 = arith.constant dense<0.000000e+00> : vector<16x64xf32>
    %292 = tpu.matmul %289, %291, %cst_117 {dimension_numbers = #tpu.dot_dimension_numbers<[1], [0], [0], [1], [0, 0, 1, 1], [], []>} : vector<16x32xbf16>, vector<32x64xbf16>, vector<16x64xf32> -> vector<16x64xf32>
    %c1_118 = arith.constant 1 : index
    %c0_119 = arith.constant 0 : index
    %c0_120 = arith.constant 0 : index
    %293 = vector.load %arg16[%c1_118, %c0_119, %c0_120] : memref<2x1x64xf32, #tpu.memory_space<vmem>>, vector<1x1x64xf32>
    %294 = vector.shape_cast %293 : vector<1x1x64xf32> to vector<1x64xf32>
    %295 = vector.broadcast %294 : vector<1x64xf32> to vector<16x64xf32>
    %296 = arith.addf %292, %295 : vector<16x64xf32>
    %297 = arith.mulf %296, %296 : vector<16x64xf32>
    %298 = arith.mulf %296, %297 : vector<16x64xf32>
    %cst_121 = arith.constant 4.471500e-02 : f32
    %299 = vector.broadcast %cst_121 : f32 to vector<16x64xf32>
    %300 = arith.mulf %299, %298 : vector<16x64xf32>
    %301 = arith.addf %296, %300 : vector<16x64xf32>
    %cst_122 = arith.constant 0.797884583 : f32
    %302 = vector.broadcast %cst_122 : f32 to vector<16x64xf32>
    %303 = arith.mulf %302, %301 : vector<16x64xf32>
    %304 = math.tanh %303 : vector<16x64xf32>
    %cst_123 = arith.constant 1.000000e+00 : f32
    %305 = vector.broadcast %cst_123 : f32 to vector<16x64xf32>
    %306 = arith.addf %305, %304 : vector<16x64xf32>
    %cst_124 = arith.constant 5.000000e-01 : f32
    %307 = vector.broadcast %cst_124 : f32 to vector<16x64xf32>
    %308 = arith.mulf %307, %306 : vector<16x64xf32>
    %309 = arith.mulf %296, %308 : vector<16x64xf32>
    %310 = arith.truncf %309 : vector<16x64xf32> to vector<16x64xbf16>
    %c1_125 = arith.constant 1 : index
    %c0_126 = arith.constant 0 : index
    %c0_127 = arith.constant 0 : index
    %311 = vector.load %arg17[%c1_125, %c0_126, %c0_127] : memref<2x64x32xbf16, #tpu.memory_space<vmem>>, vector<1x64x32xbf16>
    %312 = vector.shape_cast %311 : vector<1x64x32xbf16> to vector<64x32xbf16>
    %cst_128 = arith.constant dense<0.000000e+00> : vector<16x32xf32>
    %313 = tpu.matmul %310, %312, %cst_128 {dimension_numbers = #tpu.dot_dimension_numbers<[1], [0], [0], [1], [0, 0, 1, 1], [], []>} : vector<16x64xbf16>, vector<64x32xbf16>, vector<16x32xf32> -> vector<16x32xf32>
    %c1_129 = arith.constant 1 : index
    %c0_130 = arith.constant 0 : index
    %c0_131 = arith.constant 0 : index
    %314 = vector.load %arg18[%c1_129, %c0_130, %c0_131] : memref<2x1x32xf32, #tpu.memory_space<vmem>>, vector<1x1x32xf32>
    %315 = vector.shape_cast %314 : vector<1x1x32xf32> to vector<1x32xf32>
    %316 = vector.broadcast %315 : vector<1x32xf32> to vector<16x32xf32>
    %317 = arith.addf %313, %316 : vector<16x32xf32>
    %318 = arith.addf %317, %288 : vector<16x32xf32>
    %c1_132 = arith.constant 1 : index
    %c0_133 = arith.constant 0 : index
    %c0_134 = arith.constant 0 : index
    %319 = vector.load %arg19[%c1_132, %c0_133, %c0_134] : memref<2x1x32xf32, #tpu.memory_space<vmem>>, vector<1x1x32xf32>
    %320 = vector.shape_cast %319 : vector<1x1x32xf32> to vector<1x32xf32>
    %c1_135 = arith.constant 1 : index
    %c0_136 = arith.constant 0 : index
    %c0_137 = arith.constant 0 : index
    %321 = vector.load %arg20[%c1_135, %c0_136, %c0_137] : memref<2x1x32xf32, #tpu.memory_space<vmem>>, vector<1x1x32xf32>
    %322 = vector.shape_cast %321 : vector<1x1x32xf32> to vector<1x32xf32>
    %cst_138 = arith.constant dense<0.000000e+00> : vector<16xf32>
    %323 = vector.multi_reduction <add>, %318, %cst_138 [1] : vector<16x32xf32> to vector<16xf32>
    %324 = vector.shape_cast %323 : vector<16xf32> to vector<16x1xf32>
    %cst_139 = arith.constant 3.200000e+01 : f32
    %325 = vector.broadcast %cst_139 : f32 to vector<16x1xf32>
    %326 = arith.divf %324, %325 : vector<16x1xf32>
    %327 = vector.broadcast %326 : vector<16x1xf32> to vector<16x32xf32>
    %328 = arith.subf %318, %327 : vector<16x32xf32>
    %329 = arith.mulf %328, %328 : vector<16x32xf32>
    %cst_140 = arith.constant dense<0.000000e+00> : vector<16xf32>
    %330 = vector.multi_reduction <add>, %329, %cst_140 [1] : vector<16x32xf32> to vector<16xf32>
    %331 = vector.shape_cast %330 : vector<16xf32> to vector<16x1xf32>
    %cst_141 = arith.constant 3.200000e+01 : f32
    %332 = vector.broadcast %cst_141 : f32 to vector<16x1xf32>
    %333 = arith.divf %331, %332 : vector<16x1xf32>
    %334 = vector.broadcast %326 : vector<16x1xf32> to vector<16x32xf32>
    %335 = arith.subf %318, %334 : vector<16x32xf32>
    %cst_142 = arith.constant 9.99999996E-13 : f32
    %336 = vector.broadcast %cst_142 : f32 to vector<16x1xf32>
    %337 = arith.addf %333, %336 : vector<16x1xf32>
    %338 = math.rsqrt %337 : vector<16x1xf32>
    %339 = vector.broadcast %338 : vector<16x1xf32> to vector<16x32xf32>
    %340 = arith.mulf %335, %339 : vector<16x32xf32>
    %341 = vector.broadcast %320 : vector<1x32xf32> to vector<16x32xf32>
    %342 = arith.mulf %340, %341 : vector<16x32xf32>
    %343 = vector.broadcast %322 : vector<1x32xf32> to vector<16x32xf32>
    %344 = arith.addf %342, %343 : vector<16x32xf32>
    %345 = tpu.iota {dimensions = array<i32: 0>} : vector<8x16xi32>
    %346 = tpu.iota {dimensions = array<i32: 1>} : vector<8x16xi32>
    %c8_i32 = arith.constant 8 : i32
    %347 = vector.broadcast %c8_i32 : i32 to vector<8x16xi32>
    %348 = arith.muli %345, %347 : vector<8x16xi32>
    %349 = arith.cmpi eq, %346, %348 : vector<8x16xi32>
    %c2_i32 = arith.constant 2 : i32
    %350 = vector.broadcast %c2_i32 : i32 to vector<8x16xi32>
    %351 = arith.cmpi slt, %345, %350 : vector<8x16xi32>
    %352 = arith.andi %349, %351 : vector<8x16xi1>
    %353 = arith.extui %352 : vector<8x16xi1> to vector<8x16xi32>
    %354 = arith.sitofp %353 : vector<8x16xi32> to vector<8x16xf32>
    %cst_143 = arith.constant dense<0.000000e+00> : vector<8x32xf32>
    %355 = tpu.matmul %354, %344, %cst_143 {dimension_numbers = #tpu.dot_dimension_numbers<[1], [0], [0], [1], [0, 0, 1, 1], [], []>} : vector<8x16xf32>, vector<16x32xf32>, vector<8x32xf32> -> vector<8x32xf32>
    %356 = arith.truncf %355 : vector<8x32xf32> to vector<8x32xbf16>
    %c0_144 = arith.constant 0 : index
    %c0_145 = arith.constant 0 : index
    %357 = vector.load %arg21[%c0_144, %c0_145] : memref<32x32xbf16, #tpu.memory_space<vmem>>, vector<32x32xbf16>
    %cst_146 = arith.constant dense<0.000000e+00> : vector<8x32xf32>
    %358 = tpu.matmul %356, %357, %cst_146 {dimension_numbers = #tpu.dot_dimension_numbers<[1], [0], [0], [1], [0, 0, 1, 1], [], []>} : vector<8x32xbf16>, vector<32x32xbf16>, vector<8x32xf32> -> vector<8x32xf32>
    %c0_147 = arith.constant 0 : index
    %c0_148 = arith.constant 0 : index
    %359 = vector.load %arg22[%c0_147, %c0_148] : memref<1x32xf32, #tpu.memory_space<vmem>>, vector<1x32xf32>
    %360 = vector.broadcast %359 : vector<1x32xf32> to vector<8x32xf32>
    %361 = arith.addf %358, %360 : vector<8x32xf32>
    %362 = math.tanh %361 : vector<8x32xf32>
    %363 = arith.truncf %362 : vector<8x32xf32> to vector<8x32xbf16>
    %c0_149 = arith.constant 0 : index
    %c0_150 = arith.constant 0 : index
    %364 = vector.load %arg23[%c0_149, %c0_150] : memref<32x128xbf16, #tpu.memory_space<vmem>>, vector<32x128xbf16>
    %cst_151 = arith.constant dense<0.000000e+00> : vector<8x128xf32>
    %365 = tpu.matmul %363, %364, %cst_151 {dimension_numbers = #tpu.dot_dimension_numbers<[1], [0], [0], [1], [0, 0, 1, 1], [], []>} : vector<8x32xbf16>, vector<32x128xbf16>, vector<8x128xf32> -> vector<8x128xf32>
    %c0_152 = arith.constant 0 : index
    %c0_153 = arith.constant 0 : index
    %366 = vector.load %arg24[%c0_152, %c0_153] : memref<1x128xf32, #tpu.memory_space<vmem>>, vector<1x128xf32>
    %367 = vector.broadcast %366 : vector<1x128xf32> to vector<8x128xf32>
    %368 = arith.addf %365, %367 : vector<8x128xf32>
    %cst_154 = arith.constant 0.000000e+00 : f32
    %369 = vector.broadcast %cst_154 : f32 to vector<8x128xf32>
    %370 = arith.subf %369, %368 : vector<8x128xf32>
    %371 = math.exp %370 : vector<8x128xf32>
    %cst_155 = arith.constant 1.000000e+00 : f32
    %372 = vector.broadcast %cst_155 : f32 to vector<8x128xf32>
    %373 = arith.addf %372, %371 : vector<8x128xf32>
    %cst_156 = arith.constant 1.000000e+00 : f32
    %374 = vector.broadcast %cst_156 : f32 to vector<8x128xf32>
    %375 = arith.divf %374, %373 : vector<8x128xf32>
    %c0_157 = arith.constant 0 : index
    %c0_158 = arith.constant 0 : index
    %376 = vector.load %arg25[%c0_157, %c0_158] : memref<8x128xf32, #tpu.memory_space<vmem>>, vector<8x128xf32>
    tpu.vector_store %arg25[%c0_157, %c0_158], %375 {strides = array<i32>} : memref<8x128xf32, #tpu.memory_space<vmem>>, vector<8x128xf32>,
    return
  }
  func.func @transform_0(%arg0: i32) -> (i32, i32) {
    %c0_i32 = arith.constant 0 : i32
    %c0_i32_0 = arith.constant 0 : i32
    %c0_i32_1 = arith.constant 0 : i32
    return %c0_i32, %c0_i32_0 : i32, i32
  }
  func.func @transform_1(%arg0: i32) -> (i32, i32) {
    %c0_i32 = arith.constant 0 : i32
    %c0_i32_0 = arith.constant 0 : i32
    %c0_i32_1 = arith.constant 0 : i32
    return %c0_i32, %c0_i32_0 : i32, i32
  }
  func.func @transform_2(%arg0: i32) -> (i32, i32) {
    %c0_i32 = arith.constant 0 : i32
    %c0_i32_0 = arith.constant 0 : i32
    %c0_i32_1 = arith.constant 0 : i32
    return %c0_i32, %c0_i32_0 : i32, i32
  }
  func.func @transform_3(%arg0: i32) -> (i32, i32) {
    %c0_i32 = arith.constant 0 : i32
    %c0_i32_0 = arith.constant 0 : i32
    %c0_i32_1 = arith.constant 0 : i32
    return %c0_i32, %c0_i32_0 : i32, i32
  }
  func.func @transform_4(%arg0: i32) -> (i32, i32) {
    %c0_i32 = arith.constant 0 : i32
    %c0_i32_0 = arith.constant 0 : i32
    %c0_i32_1 = arith.constant 0 : i32
    return %c0_i32, %c0_i32_0 : i32, i32
  }
  func.func @transform_5(%arg0: i32) -> (i32, i32) {
    %c0_i32 = arith.constant 0 : i32
    %c0_i32_0 = arith.constant 0 : i32
    %c0_i32_1 = arith.constant 0 : i32
    return %c0_i32, %c0_i32_0 : i32, i32
  }
  func.func @transform_6(%arg0: i32) -> (i32, i32) {
    %c0_i32 = arith.constant 0 : i32
    %c0_i32_0 = arith.constant 0 : i32
    %c0_i32_1 = arith.constant 0 : i32
    return %c0_i32, %c0_i32_0 : i32, i32
  }
  func.func @transform_7(%arg0: i32) -> (i32, i32) {
    %c0_i32 = arith.constant 0 : i32
    %c0_i32_0 = arith.constant 0 : i32
    %c0_i32_1 = arith.constant 0 : i32
    return %c0_i32, %c0_i32_0 : i32, i32
  }
  func.func @transform_8(%arg0: i32) -> (i32, i32, i32) {
    %c0_i32 = arith.constant 0 : i32
    %c0_i32_0 = arith.constant 0 : i32
    %c0_i32_1 = arith.constant 0 : i32
    %c0_i32_2 = arith.constant 0 : i32
    return %c0_i32, %c0_i32_0, %c0_i32_1 : i32, i32, i32
  }
  func.func @transform_9(%arg0: i32) -> (i32, i32, i32) {
    %c0_i32 = arith.constant 0 : i32
    %c0_i32_0 = arith.constant 0 : i32
    %c0_i32_1 = arith.constant 0 : i32
    %c0_i32_2 = arith.constant 0 : i32
    return %c0_i32, %c0_i32_0, %c0_i32_1 : i32, i32, i32
  }
  func.func @transform_10(%arg0: i32) -> (i32, i32, i32) {
    %c0_i32 = arith.constant 0 : i32
    %c0_i32_0 = arith.constant 0 : i32
    %c0_i32_1 = arith.constant 0 : i32
    %c0_i32_2 = arith.constant 0 : i32
    return %c0_i32, %c0_i32_0, %c0_i32_1 : i32, i32, i32
  }
  func.func @transform_11(%arg0: i32) -> (i32, i32, i32) {
    %c0_i32 = arith.constant 0 : i32
    %c0_i32_0 = arith.constant 0 : i32
    %c0_i32_1 = arith.constant 0 : i32
    %c0_i32_2 = arith.constant 0 : i32
    return %c0_i32, %c0_i32_0, %c0_i32_1 : i32, i32, i32
  }
  func.func @transform_12(%arg0: i32) -> (i32, i32, i32) {
    %c0_i32 = arith.constant 0 : i32
    %c0_i32_0 = arith.constant 0 : i32
    %c0_i32_1 = arith.constant 0 : i32
    %c0_i32_2 = arith.constant 0 : i32
    return %c0_i32, %c0_i32_0, %c0_i32_1 : i32, i32, i32
  }
  func.func @transform_13(%arg0: i32) -> (i32, i32, i32) {
    %c0_i32 = arith.constant 0 : i32
    %c0_i32_0 = arith.constant 0 : i32
    %c0_i32_1 = arith.constant 0 : i32
    %c0_i32_2 = arith.constant 0 : i32
    return %c0_i32, %c0_i32_0, %c0_i32_1 : i32, i32, i32
  }
  func.func @transform_14(%arg0: i32) -> (i32, i32, i32) {
    %c0_i32 = arith.constant 0 : i32
    %c0_i32_0 = arith.constant 0 : i32
    %c0_i32_1 = arith.constant 0 : i32
    %c0_i32_2 = arith.constant 0 : i32
    return %c0_i32, %c0_i32_0, %c0_i32_1 : i32, i32, i32
  }
  func.func @transform_15(%arg0: i32) -> (i32, i32, i32) {
    %c0_i32 = arith.constant 0 : i32
    %c0_i32_0 = arith.constant 0 : i32
    %c0_i32_1 = arith.constant 0 : i32
    %c0_i32_2 = arith.constant 0 : i32
    return %c0_i32, %c0_i32_0, %c0_i32_1 : i32, i32, i32
  }
  func.func @transform_16(%arg0: i32) -> (i32, i32, i32) {
    %c0_i32 = arith.constant 0 : i32
    %c0_i32_0 = arith.constant 0 : i32
    %c0_i32_1 = arith.constant 0 : i32
    %c0_i32_2 = arith.constant 0 : i32
    return %c0_i32, %c0_i32_0, %c0_i32_1 : i32, i32, i32
  }
  func.func @transform_17(%arg0: i32) -> (i32, i32, i32) {
    %c0_i32 = arith.constant 0 : i32
    %c0_i32_0 = arith.constant 0 : i32
    %c0_i32_1 = arith.constant 0 : i32
    %c0_i32_2 = arith.constant 0 : i32
    return %c0_i32, %c0_i32_0, %c0_i32_1 : i32, i32, i32
  }
  func.func @transform_18(%arg0: i32) -> (i32, i32, i32) {
    %c0_i32 = arith.constant 0 : i32
    %c0_i32_0 = arith.constant 0 : i32
    %c0_i32_1 = arith.constant 0 : i32
    %c0_i32_2 = arith.constant 0 : i32
    return %c0_i32, %c0_i32_0, %c0_i32_1 : i32, i32, i32
  }
  func.func @transform_19(%arg0: i32) -> (i32, i32, i32) {
    %c0_i32 = arith.constant 0 : i32
    %c0_i32_0 = arith.constant 0 : i32
    %c0_i32_1 = arith.constant 0 : i32
    %c0_i32_2 = arith.constant 0 : i32
    return %c0_i32, %c0_i32_0, %c0_i32_1 : i32, i32, i32
  }
  func.func @transform_20(%arg0: i32) -> (i32, i32) {
    %c0_i32 = arith.constant 0 : i32
    %c0_i32_0 = arith.constant 0 : i32
    %c0_i32_1 = arith.constant 0 : i32
    return %c0_i32, %c0_i32_0 : i32, i32
  }
  func.func @transform_21(%arg0: i32) -> (i32, i32) {
    %c0_i32 = arith.constant 0 : i32
    %c0_i32_0 = arith.constant 0 : i32
    %c0_i32_1 = arith.constant 0 : i32
    return %c0_i32, %c0_i32_0 : i32, i32
  }
  func.func @transform_22(%arg0: i32) -> (i32, i32) {
    %c0_i32 = arith.constant 0 : i32
    %c0_i32_0 = arith.constant 0 : i32
    %c0_i32_1 = arith.constant 0 : i32
    return %c0_i32, %c0_i32_0 : i32, i32
  }
  func.func @transform_23(%arg0: i32) -> (i32, i32) {
    %c0_i32 = arith.constant 0 : i32
    %c0_i32_0 = arith.constant 0 : i32
    %c0_i32_1 = arith.constant 0 : i32
    return %c0_i32, %c0_i32_0 : i32, i32
  }
  func.func @transform_24(%arg0: i32) -> (i32, i32) {
    %c0_i32 = arith.constant 0 : i32
    %c0_i32_0 = arith.constant 0 : i32
    %c0_i32_1 = arith.constant 0 : i32
    return %c0_i32, %c0_i32_0 : i32, i32
  }
}

</mosaic_0001>

<bundles_post_ra>
// kernel: bert_ir_forward.1
= control target key start
LH: loop header
LB: loop body
LE: loop exit
PB: predicated region body
PF: predicated region fallthrough
CT: control target
= control target key end

     0   :  { %v2893_v0 = vmov 0   ;;  %v2894_v9 = vmov 0.0   ;;  %vm141_vm2 = vcmask 1043456   ;;  %v80_v27 = vlaneseq  ;;  %s2897_s26 = smov 112   ;;  %s3502_s0 = inlined_call_operand.vmem [shape: s32[16,1], index: 0, kind: input, shape index: {}]   ;;  %s3503_s3 = inlined_call_operand.vmem [shape: f32[100,32], index: 3, kind: input, shape index: {}]   ;;  %s3504_s1 = inlined_call_operand.vmem [shape: s32[16,1], index: 1, kind: input, shape index: {}]   ;;  %s3505_s5 = inlined_call_operand.vmem [shape: f32[2,32], index: 5, kind: input, shape index: {}]   ;;  %s3506_s4 = inlined_call_operand.vmem [shape: f32[16,32], index: 4, kind: input, shape index: {}]   ;;  %s3507_s8 = inlined_call_operand.vmem [shape: bf16[2,32,96], index: 8, kind: input, shape index: {}]   ;;  %s3508_s6 = inlined_call_operand.vmem [shape: f32[1,32], index: 6, kind: input, shape index: {}]   ;;  %s3509_s7 = inlined_call_operand.vmem [shape: f32[1,32], index: 7, kind: input, shape index: {}]   ;;  %s3510_s9 = inlined_call_operand.vmem [shape: f32[2,1,96], index: 9, kind: input, shape index: {}]   ;;  %s3511_s2 = inlined_call_operand.vmem [shape: s32[2,8], index: 2, kind: input, shape index: {}]   ;;  %s3512_s10 = inlined_call_operand.vmem [shape: bf16[2,32,32], index: 10, kind: input, shape index: {}]   ;;  %s3513_s11 = inlined_call_operand.vmem [shape: f32[2,1,32], index: 11, kind: input, shape index: {}]   ;;  %s3514_s14 = inlined_call_operand.vmem [shape: bf16[2,32,64], index: 14, kind: input, shape index: {}]   ;;  %s3515_s12 = inlined_call_operand.vmem [shape: f32[2,1,32], index: 12, kind: input, shape index: {}]   ;;  %s3516_s13 = inlined_call_operand.vmem [shape: f32[2,1,32], index: 13, kind: input, shape index: {}]   ;;  %s3517_s16 = inlined_call_operand.vmem [shape: bf16[2,64,32], index: 16, kind: input, shape index: {}]   ;;  %s3518_s15 = inlined_call_operand.vmem [shape: f32[2,1,64], index: 15, kind: input, shape index: {}]   ;;  %s3519_s17 = inlined_call_operand.vmem [shape: f32[2,1,32], index: 17, kind: input, shape index: {}]   ;;  %s3520_s18 = inlined_call_operand.vmem [shape: f32[2,1,32], index: 18, kind: input, shape index: {}]   ;;  %s3521_s19 = inlined_call_operand.vmem [shape: f32[2,1,32], index: 19, kind: input, shape index: {}]   ;;  %s3522_s20 = inlined_call_operand.vmem [shape: bf16[32,32], index: 20, kind: input, shape index: {}]   ;;  %s3523_s22 = inlined_call_operand.vmem [shape: bf16[32,128], index: 22, kind: input, shape index: {}]   ;;  %s3524_s21 = inlined_call_operand.vmem [shape: f32[1,32], index: 21, kind: input, shape index: {}]   ;;  %s3525_s23 = inlined_call_operand.vmem [shape: f32[1,128], index: 23, kind: input, shape index: {}]   ;;  %s3526_s24 = inlined_call_operand.vmem [shape: f32[8,128], index: 24, kind: output, shape index: {}]  }
   0x1   :  { %3533 = sst [smem:[#allocation2_spill]] %s3502_s0  ;;  %2791 = vset.pattern.permute.xlu0 %v2893_v0  ;;  %2792 = vset.pattern.permute.xlu1 %v2893_v0  ;;  %vm134_vm3 = vcmask 818176   ;;  %vm224_vm8 = vcmask 261120   ;;  %vm2895_vm9 = vmmov 0   ;;  %vm388_vm10 = vcmask 130048  }
   0x2   :  { %3534 = sst [smem:[#allocation3_spill]] %s3503_s3  ;;  %s3542_s27 = sld [smem:[#allocation2_spill]]  ;;  %2557 = vmatprep.subr.bf16.mxu1 %v2894_v9  ;;  %v3082_v28 = vand.u32 127, %v80_v27  ;;  %2561 = vmatprep.mubr.msk.bf16.mxu1 %vm2895_vm9, %v2894_v9  ;;  %vm582_vm11 = vcmask 64512   ;;  %vm1110_vm12 = vcmask 523264  }
   0x3   :  { %3535 = sst [smem:[#allocation4_spill]] %s3504_s1  ;;  %s3543_s1 = sld [smem:[#allocation3_spill]] }
   0x4   :  { %3536 = sst [smem:[#allocation5_spill]] %s3505_s5  ;;  %s3544_s5 = sld [smem:[#allocation4_spill]] }
   0x5   :  { %3537 = sst [smem:[#allocation6_spill]] %s3506_s4 }
   0x6   :  { %3538 = sst [smem:[#allocation7_spill]] %s3507_s8  ;;  %s3546_s8 = sld [smem:[#allocation6_spill]] }
   0x7   :  { %3539 = sst [smem:[#allocation8_spill]] %s3508_s6  ;;  %s3547_s6 = sld [smem:[#allocation7_spill]] }
   0x8   :  { %3540 = sst [smem:[#allocation9_spill]] %s3509_s7  ;;  %v78_v1 = vld [vmem:[%s3542_s27] sm:$0xff]  ;;  %v79_v6 = vld [vmem:[%s3542_s27 + $0x8] sm:$0xff] }
   0x9   :  { %3541 = sst [smem:[#allocation10_spill]] %s3510_s9  ;;  %v94_v2 = vld [vmem:[%s3543_s1] sm:$0xff]  ;;  %83 = vperm.xlu0 %2791, %v78_v1   ;;  %v95_v3 = vld [vmem:[%s3543_s1 + $0x8] sm:$0xff]  ;;  %v96_v4 = vld [vmem:[%s3543_s1 + $0x10] sm:$0xff]  ;;  %s3549_s25 = sld [smem:[#allocation9_spill]] }
   0xa   :  { %v97_v5 = vld [vmem:[%s3543_s1 + $0x18] sm:$0xff]  ;;  %v2756_v7 = vpack.c.bf16 %v95_v3, %v94_v2  ;;  %v98_v10 = vld [vmem:[%s3543_s1 + $0x20] sm:$0xff]  ;;  %v99_v11 = vld [vmem:[%s3543_s1 + $0x28] sm:$0xff]  ;;  %s3550_s3 = sld [smem:[#allocation10_spill]] }
   0xb   :  { %v2760_v8 = vpack.c.bf16 %v97_v5, %v96_v4  ;;  %v2764_v12 = vpack.c.bf16 %v99_v11, %v98_v10  ;;  %v100_v13 = vld [vmem:[%s3543_s1 + $0x30] sm:$0xff]  ;;  %v101_v14 = vld [vmem:[%s3543_s1 + $0x38] sm:$0xff]  ;;  %v108_v15 = vld [vmem:[%s3544_s5] sm:$0xff] }
   0xc   :  { %2757 = vmatprep.subr.bf16.mxu0 %v2756_v7  ;;  %v109_v16 = vld [vmem:[%s3544_s5 + $0x8] sm:$0xff]  ;;  %vm110_vm0 = vcmp.eq.s32.totalorder %v108_v15, 0  ;;  %v2768_v17 = vpack.c.bf16 %v101_v14, %v100_v13  ;;  %v102_v19 = vld [vmem:[%s3543_s1 + $0x40] sm:$0xff]  ;;  %v104_v23 = vld [vmem:[%s3543_s1 + $0x50] sm:$0xff]  ;;  %s3545_s5 = sld [smem:[#allocation5_spill]] }
   0xd   :  { %86 = vperm.xlu0 %2791, %v79_v6   ;;  %2759 = vmatpush3.bf16.msra.mxu0 %v2756_v7  ;;  %vm111_vm1 = vcmp.eq.s32.totalorder %v109_v16, 0  ;;  %v114_v18 = vsel %vm110_vm0, 1, %v2893_v0  ;;  %v103_v20 = vld [vmem:[%s3543_s1 + $0x48] sm:$0xff]  ;;  %v105_v24 = vld [vmem:[%s3543_s1 + $0x58] sm:$0xff]  ;;  %v106_v26 = vld [vmem:[%s3543_s1 + $0x60] sm:$0xf] }
   0xe   :  { %2761 = vmatprep.subr.bf16.mxu0 %v2760_v8  ;;  %117 = vperm.xlu1 %2792, %v114_v18   ;;  %v115_v21 = vsel %vm111_vm1, 1, %v2893_v0  ;;  %v2772_v22 = vpack.c.bf16 %v103_v20, %v102_v19  ;;  %v2776_v25 = vpack.c.bf16 %v105_v24, %v104_v23  ;;  %v107_v37 = vld [vmem:[%s3546_s8] sm:$0xff]  ;;  %v2804_v59 = vld [vmem:[%s3547_s6 + $0x8] sm:$0xff]   ;;  %s3548_s1 = sld [smem:[#allocation8_spill]]  ;;  %s2896_s8 = smov 96  }
   0xf   :  { %v2803_v58 = vld [vmem:[%s3547_s6] sm:$0xff]  }
  0x10   :  { %2558 = vmatpush3.bf16.msra.mxu1 %v2803_v58  ;;  %v2342_v14 = vld [vmem:[%s3550_s3] ss:$0 sm:$0xff] }
  0x11   :  { %2763 = vmatpush3.bf16.msra.mxu0 %v2760_v8  ;;  %2559 = vmatprep.subr.bf16.mxu1 %v2894_v9  ;;  %v2341_v8 = vld [vmem:[%s3549_s25] ss:$0 sm:$0xff] }
  0x12   :  { %2765 = vmatprep.subr.bf16.mxu0 %v2764_v12  ;;  %120 = vperm.xlu1 %2792, %v115_v21   ;;  %v2335_v35 = vld [vmem:[%s3545_s5] ss:$0 sm:$0xff]  ;;  %v2336_v36 = vld [vmem:[%s3545_s5 + $0x1] ss:$0 sm:$0xff] }
  0x14   :  { %2560 = vmatpush3.bf16.msra.mxu1 %v2804_v59  ;;  %v2340_v4 = vld [vmem:[%s3548_s1] ss:$0 sm:$0xff] }
  0x15   :  { %2767 = vmatpush3.bf16.msra.mxu0 %v2764_v12  ;;  %2565 = vmatprep.subr.bf16.mxu1 %v2894_v9 }
  0x16   :  { %2769 = vmatprep.subr.bf16.mxu0 %v2768_v17 }
  0x19   :  { %2771 = vmatpush3.bf16.msra.mxu0 %v2768_v17 }
  0x1a   :  { %2773 = vmatprep.subr.bf16.mxu0 %v2772_v22 }
  0x1d   :  { %2775 = vmatpush3.bf16.msra.mxu0 %v2772_v22 }
  0x1e   :  { %2777 = vmatprep.subr.bf16.mxu0 %v2776_v25 }
  0x21   :  { %2779 = vmatpush3.bf16.msra.mxu0 %v2776_v25 }
  0x22   :  { %2552 = vmatprep.subr.msk.mxu0 %vm141_vm2, %v106_v26 }
  0x25   :  { %2553 = vmatpush3.msk.msra.mxu0 %vm141_vm2, %v106_v26 }
  0x26   :  { %2583 = vmatprep.subr.bf16.mxu0 %v2894_v9 }
  0x88   :  { %v84_v29 = vpop.permute.xlu0 %83 }
  0x89   :  { %vm88_vm4 = vcmp.eq.s32.totalorder %v84_v29, %v3082_v28 }
  0x8a   :  { %v2333_v30 = vsel %vm88_vm4, 1.0, %v2894_v9 }
  0x8b   :  { %2554 = vmatprep.mubr.msk.f32.mxu0 %vm134_vm3, %v2333_v30 }
  0x8c   :  { %v87_v31 = vpop.permute.xlu0 %86 }
  0x8d   :  { %vm89_vm5 = vcmp.eq.s32.totalorder %v87_v31, %v3082_v28  ;;  %v118_v33 = vpop.permute.xlu1 %117 }
  0x8e   :  { %v2334_v32 = vsel %vm89_vm5, 1.0, %v2894_v9  ;;  %vm122_vm7 = vcmp.eq.s32.totalorder %v118_v33, 1 }
  0x8f   :  { %2555 = vmatmul.mubr.msk.f32.vlgmr.msra.gmra.mrb[0].mxu0 %vm134_vm3, %v2334_v32  ;;  %v132_v40 = vsel %vm122_vm7, %v2335_v35, %v2336_v36 }
  0x90   :  { %2585 = vmatprep.mubr.msk.bf16.mxu0 %vm2895_vm9, %v2894_v9 }
  0x91   :  { %v121_v34 = vpop.permute.xlu1 %120 }
  0x92   :  { %vm123_vm6 = vcmp.eq.s32.totalorder %v121_v34, 1 }
  0x93   :  { %v133_v38 = vsel %vm123_vm6, %v2335_v35, %v2336_v36 }
 0x162   :  { %v2556_v39 = vpop.f32.mrb[0].mxu0 }
 0x163   :  { %v217_v41 = vadd.f32 %v2556_v39, %v107_v37  ;;  %v211_v42 = vpop.f32.mrb[1].mxu0  ;;  %v268_v39 = vld [vmem:[%s3511_s2] sm:$0x3]  ;;  %s2899_s2 = smov 64  }
 0x164   :  { %v212_v43 = vadd.f32 %v211_v42, %v107_v37 }
 0x165   :  { %v221_v44 = vadd.f32 %v217_v41, %v133_v38  ;;  %v2898_v41 = vmov 1966171168  }
 0x166   :  { %v220_v45 = vadd.f32 %v212_v43, %v132_v40  ;;  %v269_v40 = vcvt.s32.f32 %v268_v39  ;;  %v274_v42 = vunpack.c.l.s4 %v2898_v41  ;;  %v3176_v43 = vshrl.u32 %v80_v27, 7 }
 0x167   :  { %v228_v46 = vsel %vm224_vm8, %v221_v44, 0.0 }
 0x168   :  { %229 = vadd.xlane.f32.xlu1 %v228_v46  ;;  %v225_v47 = vsel %vm224_vm8, %v220_v45, 0.0  ;;  %vm2110_vm14 = vcmp.lt.s32.totalorder %v3176_v43, 2 }
 0x169   :  { %226 = vadd.xlane.f32.xlu0 %v225_v47 }
 0x1f5   :  { %v230_v48 = vpop.xlane.xlu1 %229 }
 0x1f6   :  { %v233_v49 = vmul.f32 0.03125, %v230_v48  ;;  %v227_v50 = vpop.xlane.xlu0 %226 }
 0x1f7   :  { %v232_v51 = vmul.f32 0.03125, %v227_v50  ;;  %v297_v50 = vsub.s32 0, %v3176_v43 }
 0x1f8   :  { %v235_v52 = vsub.f32 %v221_v44, %v233_v49  ;;  %v270_v44 = vsub.f32 1.0, %v269_v40 }
 0x1f9   :  { %v234_v53 = vsub.f32 %v220_v45, %v232_v51  ;;  %v275_v45 = vunpack.c.0.s8 %v274_v42 }
 0x1fa   :  { %v237_v56 = vmul.f32 %v235_v52, %v235_v52  ;;  %v271_v46 = vmul.f32 -1e+09, %v270_v44 }
 0x1fb   :  { %v236_v54 = vmul.f32 %v234_v53, %v234_v53  ;;  %v278_v47 = vsub.s32 %v275_v45, %v3176_v43 }
 0x1fc   :  { %v241_v57 = vsel %vm224_vm8, %v237_v56, 0.0 }
 0x1fd   :  { %v238_v55 = vsel %vm224_vm8, %v236_v54, 0.0  ;;  %v279_v48 = vrot.slane %v271_v46, %v278_v47 }
 0x1fe   :  { %239 = vadd.xlane.f32.xlu0 %v238_v55 }
 0x1ff   :  { %v287_v49 = vrot.slane %v279_v48, %v278_v47 }
 0x201   :  { %v3180_v51 = vrot.slane %v287_v49, %v297_v50 }
 0x202   :  { %242 = vadd.xlane.f32.xlu0 %v241_v57 }
 0x28b   :  { %v240_v60 = vpop.xlane.xlu0 %239 }
 0x28c   :  { %v244_v61 = vmul.f32 0.03125, %v240_v60 }
 0x28e   :  { %v246_v62 = vadd.f32 1e-12, %v244_v61 }
 0x28f   :  { %v243_v63 = vpop.xlane.xlu0 %242 }
 0x290   :  { %2827 = vrsqrt.f32 %v246_v62  ;;  %v245_v0 = vmul.f32 0.03125, %v243_v63 }
 0x292   :  { %v247_v1 = vadd.f32 1e-12, %v245_v0 }
 0x294   :  { %2829 = vrsqrt.f32 %v247_v1 }
 0x29a   :  { %v2828_v2 = vpop.eup %2827 }
 0x29b   :  { %v250_v3 = vmul.f32 %v2828_v2, %v234_v53 }
 0x29d   :  { %v258_v7 = vmul.f32 %v2340_v4, %v250_v3 }
 0x29e   :  { %v2830_v5 = vpop.eup %2829 }
 0x29f   :  { %v251_v6 = vmul.f32 %v2830_v5, %v235_v52  ;;  %v3119_v11 = vadd.f32 %v2341_v8, %v258_v7  ;;  %v280_v52 = vcombine.high %v279_v48, %v279_v48 }
 0x2a1   :  { %v259_v10 = vmul.f32 %v2340_v4, %v251_v6  ;;  %v294_v56 = vrot.slane %v280_v52, %v278_v47 }
 0x2a3   :  { %v3121_v12 = vadd.f32 %v2341_v8, %v259_v10  ;;  %v3184_v59 = vrot.slane %v294_v56, %v297_v50 }
 0x2a5   :  { %v305_v13 = vpack.c.bf16 %v3121_v12, %v3119_v11 }
 0x2a7   :  { %2562 = vmatmul.mubr.msk.bf16.vlgmr.msra.gmra.mrb[0].mxu1 %vm224_vm8, %v305_v13 }
 0x2a8   :  { %2567 = vmatprep.mubr.msk.bf16.mxu1 %vm2895_vm9, %v2894_v9 }
 0x37a   :  { %v366_v15 = vpop.f32.mrb[0].mxu1 }
 0x37b   :  { %v367_v16 = vadd.f32 %v2342_v14, %v366_v15  ;;  %v2563_v17 = vpop.f32.mrb[1].mxu1 }
 0x37c   :  { %v369_v18 = vpop.f32.mrb[2].mxu1 }
 0x37d   :  { %v3131_v19 = vpack.c.bf16 %v367_v16, %v367_v16  ;;  %v370_v20 = vadd.f32 %v2342_v14, %v369_v18  ;;  %v2564_v21 = vpop.f32.mrb[3].mxu1 }
 0x37f   :  { %v2793_v22 = vpack.i.bf16 %v370_v20, %v367_v16  ;;  %386 = vrot.lane.b32.xlu0 %v3131_v19, %s2896_s8  ;;  %v3136_v23 = vpack.c.bf16 %v370_v20, %v370_v20 }
 0x381   :  { %2794 = vrot.lane.b32.xlu1 %v2793_v22, %s2897_s26 }
 0x385   :  { %436 = vrot.lane.b32.xlu1 %v3136_v23, %s2896_s8 }
 0x3f1   :  { %v387_v24 = vpop.permute.xlu0 %386 }
 0x3f2   :  { %v393_v25 = vsel %vm388_vm10, %v387_v24, 0 }
 0x3f3   :  { %2566 = vmatpush3.bf16.xpose.msra.mxu1 %v393_v25  ;;  %v2795_v26 = vpop.permute.xlu1 %2794 }
 0x3f4   :  { %v2797_v29 = vunpack.i.h.bf16 %v2795_v26  ;;  %v2796_v30 = vunpack.i.l.bf16 %v2795_v26  ;;  %2571 = vmatprep.subr.bf16.mxu1 %v2894_v9 }
 0x3f6   :  { %v3142_v31 = vpack.c.bf16 %v2797_v29, %v2797_v29  ;;  %v3144_v32 = vpack.c.bf16 %v2796_v30, %v2796_v30 }
 0x3f7   :  { %v437_v33 = vpop.permute.xlu1 %436 }
 0x3f8   :  { %534 = vrot.lane.b32.xlu0 %v3142_v31, %s2896_s8  ;;  %485 = vrot.lane.b32.xlu1 %v3144_v32, %s2896_s8  ;;  %v442_v34 = vsel %vm388_vm10, %v437_v33, 0 }
 0x3fa   :  { %2568 = vmatmul.mubr.msk.bf16.vlgmr.msra.gmra.mrb[4].mxu1 %vm388_vm10, %v3131_v19 }
 0x3fb   :  { %2572 = vmatpush3.bf16.xpose.msra.mxu1 %v442_v34  ;;  %2573 = vmatprep.mubr.msk.bf16.mxu1 %vm2895_vm9, %v2894_v9 }
 0x3fc   :  { %2577 = vmatprep.subr.bf16.mxu1 %v2894_v9 }
 0x402   :  { %2574 = vmatmul.mubr.msk.bf16.vlgmr.msra.gmra.mrb[8].mxu1 %vm388_vm10, %v3136_v23 }
 0x403   :  { %2579 = vmatprep.mubr.msk.bf16.mxu1 %vm2895_vm9, %v2894_v9 }
 0x46a   :  { %v535_v35 = vpop.permute.xlu0 %534  ;;  %v486_v36 = vpop.permute.xlu1 %485 }
 0x46b   :  { %v540_v37 = vsel %vm388_vm10, %v535_v35, 0  ;;  %v491_v38 = vsel %vm388_vm10, %v486_v36, 0 }
 0x46c   :  { %2578 = vmatpush3.bf16.xpose.msra.mxu1 %v491_v38  ;;  %2584 = vmatpush3.bf16.xpose.msra.mxu0 %v540_v37 }
 0x46d   :  { %2589 = vmatprep.subr.bf16.mxu1 %v2894_v9  ;;  %2595 = vmatprep.subr.bf16.mxu0 %v2894_v9 }
 0x473   :  { %2580 = vmatmul.mubr.msk.bf16.vlgmr.msra.gmra.mrb[12].mxu1 %vm388_vm10, %v3144_v32  ;;  %2586 = vmatmul.mubr.msk.bf16.vlgmr.msra.gmra.mrb[4].mxu0 %vm388_vm10, %v3142_v31 }
 0x474   :  { %2591 = vmatprep.mubr.msk.bf16.mxu1 %vm2895_vm9, %v2894_v9  ;;  %2597 = vmatprep.mubr.msk.bf16.mxu0 %vm2895_vm9, %v2894_v9 }
 0x4cd   :  { %v429_v53 = vpop.f32.mrb[4].mxu1 }
 0x4ce   :  { %v430_v54 = vadd.f32 %v429_v53, %v3180_v51  ;;  %v2569_v55 = vpop.f32.mrb[5].mxu1 }
 0x4cf   :  { %v432_v27 = vpop.f32.mrb[6].mxu1 }
 0x4d0   :  { %v2570_v57 = vpop.f32.mrb[7].mxu1  ;;  %v583_v58 = vsel %vm582_vm11, %v430_v54, -inf }
 0x4d1   :  { %584 = vmax.xlane.f32.xlu1 %v583_v58 }
 0x4d5   :  { %v478_v60 = vpop.f32.mrb[8].mxu1 }
 0x4d6   :  { %v479_v61 = vadd.f32 %v478_v60, %v3184_v59  ;;  %v2575_v62 = vpop.f32.mrb[9].mxu1 }
 0x4d7   :  { %v481_v63 = vpop.f32.mrb[10].mxu1 }
 0x4d8   :  { %v2576_v0 = vpop.f32.mrb[11].mxu1  ;;  %v586_v1 = vsel %vm582_vm11, %v479_v61, -inf  ;;  %v2805_v63 = vld [vmem:[%s3512_s10] sm:$0xff]  }
 0x4d9   :  { %587 = vmax.xlane.f32.xlu0 %v586_v1 }
 0x546   :  { %v527_v2 = vpop.f32.mrb[12].mxu1  ;;  %v576_v3 = vpop.f32.mrb[4].mxu0 }
 0x547   :  { %v528_v4 = vadd.f32 %v527_v2, %v3180_v51  ;;  %v577_v5 = vadd.f32 %v576_v3, %v3184_v59  ;;  %v2581_v6 = vpop.f32.mrb[13].mxu1  ;;  %v2587_v7 = vpop.f32.mrb[5].mxu0  ;;  %v2806_v2 = vld [vmem:[%s3512_s10 + $0x8] sm:$0xff]  }
 0x548   :  { %v530_v8 = vpop.f32.mrb[14].mxu1  ;;  %v579_v10 = vpop.f32.mrb[6].mxu0 }
 0x549   :  { %v2582_v13 = vpop.f32.mrb[15].mxu1  ;;  %v2588_v14 = vpop.f32.mrb[7].mxu0  ;;  %v592_v15 = vsel %vm582_vm11, %v577_v5, -inf  ;;  %v589_v16 = vsel %vm582_vm11, %v528_v4, -inf }
 0x54a   :  { %593 = vmax.xlane.f32.xlu1 %v592_v15  ;;  %590 = vmax.xlane.f32.xlu0 %v589_v16 }
 0x55b   :  { %679 = vrot.lane.b32.xlu1 %v3136_v23, %s2899_s2 }
 0x55e   :  { %v585_v17 = vpop.xlane.xlu1 %584 }
 0x55f   :  { %v595_v20 = vsub.f32 %v430_v54, %v585_v17 }
 0x560   :  { %631 = vrot.lane.b32.xlu0 %v3131_v19, %s2899_s2 }
 0x561   :  { %v599_v22 = vmul.f32 1.442695, %v595_v20 }
 0x563   :  { %2831 = vpow2.f32 %v599_v22 }
 0x566   :  { %v588_v18 = vpop.xlane.xlu0 %587 }
 0x567   :  { %v596_v21 = vsub.f32 %v479_v61, %v588_v18 }
 0x569   :  { %v601_v24 = vmul.f32 1.442695, %v596_v21 }
 0x56b   :  { %2833 = vpow2.f32 %v601_v24 }
 0x56d   :  { %v2832_v25 = vpop.eup %2831 }
 0x56e   :  { %v607_v30 = vsel %vm582_vm11, %v2832_v25, 0.0 }
 0x575   :  { %v2834_v26 = vpop.eup %2833 }
 0x576   :  { %v610_v29 = vsel %vm582_vm11, %v2834_v26, 0.0 }
 0x57f   :  { %611 = vadd.xlane.f32.xlu1 %v610_v29  ;;  %608 = vadd.xlane.f32.xlu0 %v607_v30 }
 0x5d7   :  { %v594_v23 = vpop.xlane.xlu1 %593  ;;  %v591_v33 = vpop.xlane.xlu0 %590 }
 0x5d8   :  { %v598_v34 = vsub.f32 %v577_v5, %v594_v23  ;;  %v597_v19 = vsub.f32 %v528_v4, %v591_v33 }
 0x5da   :  { %v605_v35 = vmul.f32 1.442695, %v598_v34  ;;  %v603_v36 = vmul.f32 1.442695, %v597_v19  ;;  %v2358_v34 = vld [vmem:[%s3513_s11] ss:$0 sm:$0xff] }
 0x5db   :  { %v680_v37 = vpop.permute.xlu1 %679  ;;  %v632_v38 = vpop.permute.xlu0 %631 }
 0x5dc   :  { %2835 = vpow2.f32 %v605_v35  ;;  %v685_v39 = vsel %vm141_vm2, %v680_v37, 0  ;;  %v637_v40 = vsel %vm141_vm2, %v632_v38, 0 }
 0x5dd   :  { %2837 = vpow2.f32 %v603_v36  ;;  %2590 = vmatpush3.bf16.msra.mxu1 %v637_v40  ;;  %2596 = vmatpush3.bf16.msra.mxu0 %v685_v39 }
 0x5de   :  { %2601 = vmatprep.subr.bf16.mxu1 %v2894_v9  ;;  %2607 = vmatprep.subr.bf16.mxu0 %v2894_v9 }
 0x5e6   :  { %v2836_v41 = vpop.eup %2835 }
 0x5e7   :  { %v2838_v42 = vpop.eup %2837  ;;  %v616_v44 = vsel %vm582_vm11, %v2836_v41, 0.0 }
 0x5e8   :  { %617 = vadd.xlane.f32.xlu1 %v616_v44  ;;  %v613_v45 = vsel %vm582_vm11, %v2838_v42, 0.0 }
 0x5e9   :  { %614 = vadd.xlane.f32.xlu0 %v613_v45 }
 0x5f9   :  { %727 = vrot.lane.b32.xlu1 %v3144_v32, %s2899_s2 }
 0x5ff   :  { %775 = vrot.lane.b32.xlu0 %v3142_v31, %s2899_s2 }
 0x60c   :  { %v612_v46 = vpop.xlane.xlu1 %611  ;;  %v609_v47 = vpop.xlane.xlu0 %608 }
 0x60d   :  { %2839 = vrcp.f32 %v612_v46 }
 0x60e   :  { %2841 = vrcp.f32 %v609_v47 }
 0x617   :  { %v2840_v48 = vpop.eup %2839 }
 0x618   :  { %v2842_v49 = vpop.eup %2841  ;;  %v624_v50 = vmul.f32 %v2840_v48, %v2834_v26 }
 0x619   :  { %v623_v52 = vmul.f32 %v2842_v49, %v2832_v25 }
 0x61a   :  { %v628_v53 = vpack.c.bf16 %v624_v50, %v624_v50 }
 0x61b   :  { %v627_v54 = vpack.c.bf16 %v623_v52, %v623_v52 }
 0x61c   :  { %2598 = vmatmul.mubr.msk.bf16.vlgmr.msra.gmra.mrb[8].mxu0 %vm582_vm11, %v628_v53 }
 0x61d   :  { %2592 = vmatmul.mubr.msk.bf16.vlgmr.msra.gmra.mrb[16].mxu1 %vm582_vm11, %v627_v54  ;;  %2609 = vmatprep.mubr.msk.bf16.mxu0 %vm2895_vm9, %v2894_v9 }
 0x61e   :  { %2603 = vmatprep.mubr.msk.bf16.mxu1 %vm2895_vm9, %v2894_v9 }
 0x675   :  { %v618_v31 = vpop.xlane.xlu1 %617 }
 0x676   :  { %2843 = vrcp.f32 %v618_v31  ;;  %v615_v32 = vpop.xlane.xlu0 %614 }
 0x677   :  { %2845 = vrcp.f32 %v615_v32  ;;  %v2808_v32 = vld [vmem:[%s3514_s14 + $0x8] sm:$0xff]  }
 0x679   :  { %v728_v55 = vpop.permute.xlu1 %727 }
 0x67a   :  { %v733_v56 = vsel %vm141_vm2, %v728_v55, 0  ;;  %v776_v27 = vpop.permute.xlu0 %775 }
 0x67b   :  { %v781_v57 = vsel %vm141_vm2, %v776_v27, 0  ;;  %2602 = vmatpush3.bf16.msra.mxu1 %v733_v56 }
 0x67c   :  { %2608 = vmatpush3.bf16.msra.mxu0 %v781_v57  ;;  %2613 = vmatprep.subr.bf16.mxu1 %v2894_v9 }
 0x67d   :  { %2619 = vmatprep.subr.bf16.mxu0 %v2894_v9 }
 0x680   :  { %v2844_v58 = vpop.eup %2843 }
 0x681   :  { %v2846_v60 = vpop.eup %2845  ;;  %v626_v61 = vmul.f32 %v2844_v58, %v2836_v41 }
 0x682   :  { %v625_v62 = vmul.f32 %v2846_v60, %v2838_v42 }
 0x683   :  { %v630_v0 = vpack.c.bf16 %v626_v61, %v626_v61 }
 0x684   :  { %v629_v1 = vpack.c.bf16 %v625_v62, %v625_v62  ;;  %v2359_v62 = vld [vmem:[%s3515_s12] ss:$0 sm:$0xff] }
 0x685   :  { %2610 = vmatmul.mubr.msk.bf16.vlgmr.msra.gmra.mrb[12].mxu0 %vm582_vm11, %v630_v0 }
 0x686   :  { %2604 = vmatmul.mubr.msk.bf16.vlgmr.msra.gmra.mrb[20].mxu1 %vm582_vm11, %v629_v1  ;;  %2620 = vmatpush3.bf16.msra.mxu0 %v2805_v63 }
 0x687   :  { %2621 = vmatprep.mubr.msk.bf16.mxu0 %vm2895_vm9, %v2894_v9  ;;  %2615 = vmatprep.mubr.msk.bf16.mxu1 %vm2895_vm9, %v2894_v9 }
 0x688   :  { %2633 = vmatprep.subr.bf16.mxu0 %v2894_v9  ;;  %2614 = vmatpush3.bf16.msra.mxu1 %v2806_v2 }
 0x689   :  { %2625 = vmatprep.subr.bf16.mxu1 %v2894_v9 }
 0x6ef   :  { %v721_v3 = vpop.f32.mrb[8].mxu0 }
 0x6f0   :  { %v673_v4 = vpop.f32.mrb[16].mxu1  ;;  %v2599_v5 = vpop.f32.mrb[9].mxu0 }
 0x6f1   :  { %v827_v6 = vpack.c.bf16 %v721_v3, %v673_v4  ;;  %v2593_v7 = vpop.f32.mrb[17].mxu1  ;;  %v724_v8 = vpop.f32.mrb[10].mxu0  ;;  %v2360_v3 = vld [vmem:[%s3516_s13] ss:$0 sm:$0xff] }
 0x6f2   :  { %v676_v10 = vpop.f32.mrb[18].mxu1  ;;  %v2600_v13 = vpop.f32.mrb[11].mxu0  ;;  %v2809_v8 = vld [vmem:[%s3517_s16] sm:$0xff]  }
 0x6f3   :  { %v2594_v14 = vpop.f32.mrb[19].mxu1  ;;  %2622 = vmatmul.mubr.msk.bf16.vlgmr.msra.gmra.mrb[16].mxu0 %vm388_vm10, %v827_v6  ;;  %v2810_v10 = vld [vmem:[%s3517_s16 + $0x8] sm:$0xff]   ;;  %v2811_v13 = vld [vmem:[%s3517_s16 + $0x10] sm:$0xff]  }
 0x6f4   :  { %2641 = vmatprep.mubr.msk.bf16.mxu0 %vm2895_vm9, %v2894_v9  ;;  %2634 = vmatpush3.bf16.msra.mxu0 %v2809_v8  ;;  %v2812_v14 = vld [vmem:[%s3517_s16 + $0x18] sm:$0xff]  }
 0x6f5   :  { %2635 = vmatprep.subr.bf16.mxu0 %v2894_v9 }
 0x6f8   :  { %2636 = vmatpush3.bf16.msra.mxu0 %v2810_v10  ;;  %v2371_v10 = vld [vmem:[%s3520_s18] ss:$0 sm:$0xff] }
 0x6f9   :  { %2637 = vmatprep.subr.bf16.mxu0 %v2894_v9 }
 0x6fc   :  { %2638 = vmatpush3.bf16.msra.mxu0 %v2811_v13 }
 0x6fd   :  { %2639 = vmatprep.subr.bf16.mxu0 %v2894_v9 }
 0x700   :  { %2640 = vmatpush3.bf16.msra.mxu0 %v2812_v14 }
 0x701   :  { %2659 = vmatprep.subr.bf16.mxu0 %v2894_v9 }
 0x758   :  { %v817_v15 = vpop.f32.mrb[12].mxu0 }
 0x759   :  { %v769_v16 = vpop.f32.mrb[20].mxu1  ;;  %v2611_v17 = vpop.f32.mrb[13].mxu0 }
 0x75a   :  { %v828_v18 = vpack.c.bf16 %v817_v15, %v769_v16  ;;  %v2605_v20 = vpop.f32.mrb[21].mxu1  ;;  %v820_v21 = vpop.f32.mrb[14].mxu0  ;;  %v2361_v15 = vld [vmem:[%s3518_s15] ss:$0 sm:$0xff] }
 0x75b   :  { %v772_v22 = vpop.f32.mrb[22].mxu1  ;;  %v2612_v24 = vpop.f32.mrb[15].mxu0 }
 0x75c   :  { %v2606_v25 = vpop.f32.mrb[23].mxu1  ;;  %2616 = vmatmul.mubr.msk.bf16.vlgmr.msra.gmra.mrb[24].mxu1 %vm388_vm10, %v828_v18 }
 0x75d   :  { %2629 = vmatprep.mubr.msk.bf16.mxu1 %vm2895_vm9, %v2894_v9 }
 0x7c6   :  { %v922_v26 = vpop.f32.mrb[16].mxu0 }
 0x7c7   :  { %v2623_v29 = vpop.f32.mrb[17].mxu0 }
 0x7c8   :  { %v925_v30 = vpop.f32.mrb[18].mxu0 }
 0x7c9   :  { %v2624_v23 = vpop.f32.mrb[19].mxu0 }
 0x82f   :  { %v872_v33 = vpop.f32.mrb[24].mxu1 }
 0x830   :  { %v923_v19 = vadd.f32 %v922_v26, %v872_v33  ;;  %v2617_v35 = vpop.f32.mrb[25].mxu1 }
 0x831   :  { %v875_v36 = vpop.f32.mrb[26].mxu1 }
 0x832   :  { %v936_v37 = vadd.f32 %v2358_v34, %v923_v19  ;;  %v926_v38 = vadd.f32 %v925_v30, %v875_v36  ;;  %v2618_v39 = vpop.f32.mrb[27].mxu1 }
 0x834   :  { %v937_v40 = vadd.f32 %v2358_v34, %v926_v38  ;;  %v938_v41 = vadd.f32 %v936_v37, %v3119_v11 }
 0x836   :  { %v942_v42 = vsel %vm224_vm8, %v938_v41, 0.0  ;;  %v939_v44 = vadd.f32 %v937_v40, %v3121_v12  ;;  %v2807_v12 = vld [vmem:[%s3514_s14] sm:$0xff]  }
 0x837   :  { %943 = vadd.xlane.f32.xlu1 %v942_v42  ;;  %2626 = vmatpush3.bf16.msra.mxu1 %v2807_v12 }
 0x838   :  { %v945_v45 = vsel %vm224_vm8, %v939_v44, 0.0  ;;  %2627 = vmatprep.subr.bf16.mxu1 %v2894_v9 }
 0x839   :  { %946 = vadd.xlane.f32.xlu0 %v945_v45 }
 0x83b   :  { %2628 = vmatpush3.bf16.msra.mxu1 %v2808_v32 }
 0x83c   :  { %2645 = vmatprep.subr.bf16.mxu1 %v2894_v9 }
 0x8c4   :  { %v944_v46 = vpop.xlane.xlu1 %943 }
 0x8c5   :  { %v948_v47 = vmul.f32 0.03125, %v944_v46  ;;  %v2365_v46 = vld [vmem:[%s3519_s17] ss:$0 sm:$0xff] }
 0x8c6   :  { %v947_v48 = vpop.xlane.xlu0 %946 }
 0x8c7   :  { %v950_v49 = vsub.f32 %v938_v41, %v948_v47  ;;  %v949_v50 = vmul.f32 0.03125, %v947_v48 }
 0x8c9   :  { %v951_v52 = vsub.f32 %v939_v44, %v949_v50  ;;  %v952_v53 = vmul.f32 %v950_v49, %v950_v49 }
 0x8cb   :  { %v954_v54 = vsel %vm224_vm8, %v952_v53, 0.0  ;;  %v953_v31 = vmul.f32 %v951_v52, %v951_v52 }
 0x8cc   :  { %955 = vadd.xlane.f32.xlu0 %v954_v54 }
 0x8cd   :  { %v957_v11 = vsel %vm224_vm8, %v953_v31, 0.0 }
 0x8ce   :  { %958 = vadd.xlane.f32.xlu1 %v957_v11 }
 0x959   :  { %v956_v55 = vpop.xlane.xlu0 %955 }
 0x95a   :  { %v960_v56 = vmul.f32 0.03125, %v956_v55 }
 0x95b   :  { %v959_v27 = vpop.xlane.xlu1 %958 }
 0x95c   :  { %v962_v57 = vadd.f32 1e-12, %v960_v56  ;;  %v961_v58 = vmul.f32 0.03125, %v959_v27 }
 0x95e   :  { %2847 = vrsqrt.f32 %v962_v57  ;;  %v963_v60 = vadd.f32 1e-12, %v961_v58 }
 0x960   :  { %2849 = vrsqrt.f32 %v963_v60 }
 0x968   :  { %v2848_v61 = vpop.eup %2847 }
 0x969   :  { %v966_v63 = vmul.f32 %v2848_v61, %v950_v49 }
 0x96a   :  { %v2850_v0 = vpop.eup %2849 }
 0x96b   :  { %v974_v1 = vmul.f32 %v2359_v62, %v966_v63  ;;  %v967_v2 = vmul.f32 %v2850_v0, %v951_v52  ;;  %v2813_v0 = vld [vmem:[%s3547_s6 + $0x10] sm:$0xff]  }
 0x96d   :  { %v975_v4 = vmul.f32 %v2359_v62, %v967_v2  ;;  %v982_v5 = vadd.f32 %v2360_v3, %v974_v1  ;;  %v2814_v1 = vld [vmem:[%s3547_s6 + $0x18] sm:$0xff]  }
 0x96f   :  { %v983_v6 = vadd.f32 %v2360_v3, %v975_v4 }
 0x971   :  { %v984_v7 = vpack.c.bf16 %v983_v6, %v982_v5 }
 0x973   :  { %2630 = vmatmul.mubr.msk.bf16.vlgmr.msra.gmra.mrb[28].mxu1 %vm224_vm8, %v984_v7 }
 0x974   :  { %2649 = vmatprep.mubr.msk.bf16.mxu1 %vm2895_vm9, %v2894_v9  ;;  %2646 = vmatpush3.bf16.msra.mxu1 %v2813_v0 }
 0x975   :  { %2647 = vmatprep.subr.bf16.mxu1 %v2894_v9 }
 0x978   :  { %2648 = vmatpush3.bf16.msra.mxu1 %v2814_v1 }
 0x979   :  { %2653 = vmatprep.subr.bf16.mxu1 %v2894_v9 }
 0xa46   :  { %v1045_v16 = vpop.f32.mrb[28].mxu1 }
 0xa47   :  { %v1046_v17 = vadd.f32 %v2361_v15, %v1045_v16  ;;  %v2631_v18 = vpop.f32.mrb[29].mxu1 }
 0xa48   :  { %v1048_v20 = vpop.f32.mrb[30].mxu1 }
 0xa49   :  { %v1052_v21 = vmul.f32 %v1046_v17, %v1046_v17  ;;  %v1049_v22 = vadd.f32 %v2361_v15, %v1048_v20  ;;  %v2632_v24 = vpop.f32.mrb[31].mxu1 }
 0xa4a   :  { %v2378_v24 = vld [vmem:[%s3550_s3 + $0x1] ss:$0 sm:$0xff] }
 0xa4b   :  { %v1054_v25 = vmul.f32 %v1052_v21, %v1046_v17  ;;  %v1053_v26 = vmul.f32 %v1049_v22, %v1049_v22 }
 0xa4d   :  { %v1056_v29 = vmul.f32 0.044715, %v1054_v25  ;;  %v1055_v30 = vmul.f32 %v1053_v26, %v1049_v22 }
 0xa4f   :  { %v1058_v23 = vadd.f32 %v1056_v29, %v1046_v17  ;;  %v1057_v33 = vmul.f32 0.044715, %v1055_v30 }
 0xa51   :  { %v1060_v34 = vmul.f32 0.7978846, %v1058_v23  ;;  %v1059_v19 = vadd.f32 %v1057_v33, %v1049_v22 }
 0xa53   :  { %2851 = vtanh.f32 %v1060_v34  ;;  %v1061_v35 = vmul.f32 0.7978846, %v1059_v19 }
 0xa55   :  { %2853 = vtanh.f32 %v1061_v35 }
 0xa5d   :  { %v2852_v36 = vpop.eup %2851 }
 0xa5e   :  { %v1064_v37 = vadd.f32 1.0, %v2852_v36 }
 0xa5f   :  { %v2854_v38 = vpop.eup %2853 }
 0xa60   :  { %v1066_v39 = vmul.f32 0.5, %v1064_v37  ;;  %v1065_v40 = vadd.f32 1.0, %v2854_v38 }
 0xa62   :  { %v1067_v41 = vmul.f32 0.5, %v1065_v40  ;;  %v1068_v42 = vmul.f32 %v1066_v39, %v1046_v17  ;;  %v2372_v17 = vld [vmem:[%s3521_s19] ss:$0 sm:$0xff] }
 0xa64   :  { %v1069_v44 = vmul.f32 %v1067_v41, %v1049_v22 }
 0xa66   :  { %v1070_v45 = vpack.c.bf16 %v1069_v44, %v1068_v42 }
 0xa68   :  { %2642 = vmatmul.mubr.msk.bf16.vlgmr.msra.gmra.mrb[20].mxu0 %vm1110_vm12, %v1070_v45 }
 0xa69   :  { %2661 = vmatprep.mubr.msk.bf16.mxu0 %vm2895_vm9, %v2894_v9 }
 0xb3b   :  { %v1148_v47 = vpop.f32.mrb[20].mxu0 }
 0xb3c   :  { %v1149_v48 = vadd.f32 %v2365_v46, %v1148_v47  ;;  %v2643_v49 = vpop.f32.mrb[21].mxu0 }
 0xb3d   :  { %v1151_v50 = vpop.f32.mrb[22].mxu0 }
 0xb3e   :  { %v1152_v52 = vadd.f32 %v2365_v46, %v1151_v50  ;;  %v2644_v53 = vpop.f32.mrb[23].mxu0  ;;  %v1155_v54 = vadd.f32 %v1149_v48, %v982_v5 }
 0xb40   :  { %v1159_v31 = vsel %vm224_vm8, %v1155_v54, 0.0  ;;  %v1156_v11 = vadd.f32 %v1152_v52, %v983_v6 }
 0xb41   :  { %1160 = vadd.xlane.f32.xlu0 %v1159_v31 }
 0xb42   :  { %v1162_v12 = vsel %vm224_vm8, %v1156_v11, 0.0 }
 0xb43   :  { %1163 = vadd.xlane.f32.xlu1 %v1162_v12 }
 0xbce   :  { %v1161_v32 = vpop.xlane.xlu0 %1160 }
 0xbcf   :  { %v1165_v55 = vmul.f32 0.03125, %v1161_v32 }
 0xbd0   :  { %v1164_v56 = vpop.xlane.xlu1 %1163 }
 0xbd1   :  { %v1167_v27 = vsub.f32 %v1155_v54, %v1165_v55  ;;  %v1166_v57 = vmul.f32 0.03125, %v1164_v56 }
 0xbd3   :  { %v1168_v58 = vsub.f32 %v1156_v11, %v1166_v57  ;;  %v1169_v60 = vmul.f32 %v1167_v27, %v1167_v27 }
 0xbd5   :  { %v1171_v61 = vsel %vm224_vm8, %v1169_v60, 0.0  ;;  %v1170_v62 = vmul.f32 %v1168_v58, %v1168_v58 }
 0xbd6   :  { %1172 = vadd.xlane.f32.xlu0 %v1171_v61 }
 0xbd7   :  { %v1174_v63 = vsel %vm224_vm8, %v1170_v62, 0.0 }
 0xbd8   :  { %1175 = vadd.xlane.f32.xlu1 %v1174_v63 }
 0xc63   :  { %v1173_v2 = vpop.xlane.xlu0 %1172 }
 0xc64   :  { %v1177_v3 = vmul.f32 0.03125, %v1173_v2 }
 0xc65   :  { %v1176_v4 = vpop.xlane.xlu1 %1175 }
 0xc66   :  { %v1179_v5 = vadd.f32 1e-12, %v1177_v3  ;;  %v1178_v6 = vmul.f32 0.03125, %v1176_v4 }
 0xc68   :  { %2855 = vrsqrt.f32 %v1179_v5  ;;  %v1180_v7 = vadd.f32 1e-12, %v1178_v6 }
 0xc6a   :  { %2857 = vrsqrt.f32 %v1180_v7 }
 0xc72   :  { %v2856_v8 = vpop.eup %2855 }
 0xc73   :  { %v1183_v13 = vmul.f32 %v2856_v8, %v1167_v27 }
 0xc74   :  { %v2858_v14 = vpop.eup %2857 }
 0xc75   :  { %v1191_v15 = vmul.f32 %v2371_v10, %v1183_v13  ;;  %v1184_v16 = vmul.f32 %v2858_v14, %v1168_v58 }
 0xc77   :  { %v1192_v18 = vmul.f32 %v2371_v10, %v1184_v16  ;;  %v3307_v20 = vadd.f32 %v2372_v17, %v1191_v15 }
 0xc79   :  { %v3309_v21 = vadd.f32 %v2372_v17, %v1192_v18 }
 0xc7b   :  { %v1201_v22 = vpack.c.bf16 %v3309_v21, %v3307_v20 }
 0xc7d   :  { %2650 = vmatmul.mubr.msk.bf16.vlgmr.msra.gmra.mrb[32].mxu1 %vm224_vm8, %v1201_v22 }
 0xc7e   :  { %2655 = vmatprep.mubr.msk.bf16.mxu1 %vm2895_vm9, %v2894_v9 }
 0xd50   :  { %v1264_v25 = vpop.f32.mrb[32].mxu1 }
 0xd51   :  { %v1265_v26 = vadd.f32 %v2378_v24, %v1264_v25  ;;  %v2651_v29 = vpop.f32.mrb[33].mxu1 }
 0xd52   :  { %v1267_v30 = vpop.f32.mrb[34].mxu1 }
 0xd53   :  { %v1279_v23 = vpack.c.bf16 %v1265_v26, %v1265_v26  ;;  %v1268_v33 = vadd.f32 %v2378_v24, %v1267_v30  ;;  %v2652_v34 = vpop.f32.mrb[35].mxu1 }
 0xd55   :  { %v2798_v19 = vpack.i.bf16 %v1268_v33, %v1265_v26  ;;  %1284 = vrot.lane.b32.xlu1 %v1279_v23, %s2896_s8  ;;  %v3320_v35 = vpack.c.bf16 %v1268_v33, %v1268_v33 }
 0xd57   :  { %2799 = vrot.lane.b32.xlu0 %v2798_v19, %s2897_s26 }
 0xd59   :  { %1333 = vrot.lane.b32.xlu1 %v3320_v35, %s2896_s8 }
 0xdc7   :  { %v1285_v36 = vpop.permute.xlu1 %1284 }
 0xdc8   :  { %v1290_v37 = vsel %vm388_vm10, %v1285_v36, 0 }
 0xdc9   :  { %2654 = vmatpush3.bf16.xpose.msra.mxu1 %v1290_v37  ;;  %v2800_v38 = vpop.permute.xlu0 %2799 }
 0xdca   :  { %v2802_v39 = vunpack.i.h.bf16 %v2800_v38  ;;  %v2801_v40 = vunpack.i.l.bf16 %v2800_v38  ;;  %2665 = vmatprep.subr.bf16.mxu1 %v2894_v9 }
 0xdcb   :  { %v1334_v41 = vpop.permute.xlu1 %1333 }
 0xdcc   :  { %v3327_v42 = vpack.c.bf16 %v2802_v39, %v2802_v39  ;;  %v3329_v44 = vpack.c.bf16 %v2801_v40, %v2801_v40  ;;  %v1339_v45 = vsel %vm388_vm10, %v1334_v41, 0 }
 0xdcd   :  { %2660 = vmatpush3.bf16.xpose.msra.mxu0 %v1339_v45 }
 0xdce   :  { %1382 = vrot.lane.b32.xlu0 %v3329_v44, %s2896_s8  ;;  %1431 = vrot.lane.b32.xlu1 %v3327_v42, %s2896_s8 }
 0xdcf   :  { %2671 = vmatprep.subr.bf16.mxu0 %v2894_v9 }
 0xdd0   :  { %2656 = vmatmul.mubr.msk.bf16.vlgmr.msra.gmra.mrb[36].mxu1 %vm388_vm10, %v1279_v23 }
 0xdd1   :  { %2667 = vmatprep.mubr.msk.bf16.mxu1 %vm2895_vm9, %v2894_v9 }
 0xdd4   :  { %2662 = vmatmul.mubr.msk.bf16.vlgmr.msra.gmra.mrb[24].mxu0 %vm388_vm10, %v3320_v35 }
 0xdd5   :  { %2673 = vmatprep.mubr.msk.bf16.mxu0 %vm2895_vm9, %v2894_v9 }
 0xe40   :  { %v1383_v46 = vpop.permute.xlu0 %1382  ;;  %v1432_v47 = vpop.permute.xlu1 %1431 }
 0xe41   :  { %v1388_v48 = vsel %vm388_vm10, %v1383_v46, 0  ;;  %v1437_v49 = vsel %vm388_vm10, %v1432_v47, 0 }
 0xe42   :  { %2666 = vmatpush3.bf16.xpose.msra.mxu1 %v1388_v48  ;;  %2672 = vmatpush3.bf16.xpose.msra.mxu0 %v1437_v49 }
 0xe43   :  { %2677 = vmatprep.subr.bf16.mxu1 %v2894_v9  ;;  %2683 = vmatprep.subr.bf16.mxu0 %v2894_v9 }
 0xe49   :  { %2668 = vmatmul.mubr.msk.bf16.vlgmr.msra.gmra.mrb[40].mxu1 %vm388_vm10, %v3329_v44  ;;  %2674 = vmatmul.mubr.msk.bf16.vlgmr.msra.gmra.mrb[28].mxu0 %vm388_vm10, %v3327_v42 }
 0xe4a   :  { %2679 = vmatprep.mubr.msk.bf16.mxu1 %vm2895_vm9, %v2894_v9  ;;  %2685 = vmatprep.mubr.msk.bf16.mxu0 %vm2895_vm9, %v2894_v9 }
 0xea3   :  { %v1326_v50 = vpop.f32.mrb[36].mxu1 }
 0xea4   :  { %v1327_v52 = vadd.f32 %v1326_v50, %v3180_v51  ;;  %v2657_v53 = vpop.f32.mrb[37].mxu1 }
 0xea5   :  { %v1329_v54 = vpop.f32.mrb[38].mxu1 }
 0xea6   :  { %v2658_v31 = vpop.f32.mrb[39].mxu1  ;;  %v1479_v11 = vsel %vm582_vm11, %v1327_v52, -inf }
 0xea7   :  { %v1375_v12 = vpop.f32.mrb[24].mxu0  ;;  %1480 = vmax.xlane.f32.xlu0 %v1479_v11 }
 0xea8   :  { %v1376_v32 = vadd.f32 %v1375_v12, %v3184_v59  ;;  %v2663_v55 = vpop.f32.mrb[25].mxu0 }
 0xea9   :  { %v1378_v56 = vpop.f32.mrb[26].mxu0 }
 0xeaa   :  { %v2664_v27 = vpop.f32.mrb[27].mxu0  ;;  %v1482_v57 = vsel %vm582_vm11, %v1376_v32, -inf  ;;  %v2815_v56 = vld [vmem:[%s3512_s10 + $0x10] sm:$0xff]  }
 0xeab   :  { %1483 = vmax.xlane.f32.xlu1 %v1482_v57  ;;  %v2816_v27 = vld [vmem:[%s3512_s10 + $0x18] sm:$0xff]  }
 0xebc   :  { %1527 = vrot.lane.b32.xlu1 %v1279_v23, %s2899_s2 }
 0xf1c   :  { %v1424_v58 = vpop.f32.mrb[40].mxu1  ;;  %v1473_v60 = vpop.f32.mrb[28].mxu0 }
 0xf1d   :  { %v1425_v61 = vadd.f32 %v1424_v58, %v3180_v51  ;;  %v2669_v62 = vpop.f32.mrb[41].mxu1  ;;  %v2675_v63 = vpop.f32.mrb[29].mxu0  ;;  %v1474_v2 = vadd.f32 %v1473_v60, %v3184_v59 }
 0xf1e   :  { %v1427_v0 = vpop.f32.mrb[42].mxu1  ;;  %v1476_v1 = vpop.f32.mrb[30].mxu0 }
 0xf1f   :  { %v2670_v3 = vpop.f32.mrb[43].mxu1  ;;  %v2676_v4 = vpop.f32.mrb[31].mxu0  ;;  %v1485_v5 = vsel %vm582_vm11, %v1425_v61, -inf  ;;  %v1488_v6 = vsel %vm582_vm11, %v1474_v2, -inf }
 0xf20   :  { %1486 = vmax.xlane.f32.xlu0 %v1485_v5 }
 0xf24   :  { %1489 = vmax.xlane.f32.xlu0 %v1488_v6 }
 0xf34   :  { %v1481_v7 = vpop.xlane.xlu0 %1480 }
 0xf35   :  { %v1491_v8 = vsub.f32 %v1327_v52, %v1481_v7 }
 0xf37   :  { %v1495_v10 = vmul.f32 1.442695, %v1491_v8 }
 0xf38   :  { %v1484_v13 = vpop.xlane.xlu1 %1483 }
 0xf39   :  { %2859 = vpow2.f32 %v1495_v10  ;;  %v1492_v51 = vsub.f32 %v1376_v32, %v1484_v13 }
 0xf3b   :  { %v1497_v14 = vmul.f32 1.442695, %v1492_v51 }
 0xf3c   :  { %v1528_v15 = vpop.permute.xlu1 %1527 }
 0xf3d   :  { %2861 = vpow2.f32 %v1497_v14  ;;  %v1533_v16 = vsel %vm141_vm2, %v1528_v15, 0 }
 0xf3e   :  { %2678 = vmatpush3.bf16.msra.mxu1 %v1533_v16 }
 0xf3f   :  { %2689 = vmatprep.subr.bf16.mxu1 %v2894_v9 }
 0xf43   :  { %v2860_v59 = vpop.eup %2859 }
 0xf44   :  { %v1503_v17 = vsel %vm582_vm11, %v2860_v59, 0.0 }
 0xf45   :  { %1504 = vadd.xlane.f32.xlu1 %v1503_v17 }
 0xf47   :  { %v2862_v18 = vpop.eup %2861 }
 0xf48   :  { %v1506_v22 = vsel %vm582_vm11, %v2862_v18, 0.0 }
 0xf49   :  { %1507 = vadd.xlane.f32.xlu0 %v1506_v22 }
 0xfad   :  { %v1487_v24 = vpop.xlane.xlu0 %1486 }
 0xfae   :  { %v1493_v25 = vsub.f32 %v1425_v61, %v1487_v24 }
 0xfb0   :  { %v1499_v26 = vmul.f32 1.442695, %v1493_v25 }
 0xfb1   :  { %v1490_v29 = vpop.xlane.xlu0 %1489 }
 0xfb2   :  { %2863 = vpow2.f32 %v1499_v26  ;;  %v1494_v30 = vsub.f32 %v1474_v2, %v1490_v29 }
 0xfb4   :  { %v1501_v23 = vmul.f32 1.442695, %v1494_v30 }
 0xfb6   :  { %2865 = vpow2.f32 %v1501_v23 }
 0xfbc   :  { %v2864_v33 = vpop.eup %2863 }
 0xfbd   :  { %v1509_v34 = vsel %vm582_vm11, %v2864_v33, 0.0 }
 0xfbe   :  { %1510 = vadd.xlane.f32.xlu1 %v1509_v34 }
 0xfc0   :  { %v2866_v19 = vpop.eup %2865 }
 0xfc1   :  { %v1512_v36 = vsel %vm582_vm11, %v2866_v19, 0.0 }
 0xfc2   :  { %1513 = vadd.xlane.f32.xlu0 %v1512_v36 }
 0xfcf   :  { %1623 = vrot.lane.b32.xlu1 %v3329_v44, %s2899_s2 }
 0xfd2   :  { %v1505_v37 = vpop.xlane.xlu1 %1504 }
 0xfd3   :  { %2867 = vrcp.f32 %v1505_v37  ;;  %1671 = vrot.lane.b32.xlu1 %v3327_v42, %s2899_s2 }
 0xfd6   :  { %v1508_v41 = vpop.xlane.xlu0 %1507 }
 0xfd7   :  { %2869 = vrcp.f32 %v1508_v41 }
 0xfd8   :  { %1575 = vrot.lane.b32.xlu0 %v3320_v35, %s2899_s2 }
 0xfdd   :  { %v2868_v38 = vpop.eup %2867 }
 0xfde   :  { %v1519_v39 = vmul.f32 %v2868_v38, %v2860_v59 }
 0xfe0   :  { %v1523_v40 = vpack.c.bf16 %v1519_v39, %v1519_v39 }
 0xfe1   :  { %v2870_v44 = vpop.eup %2869 }
 0xfe2   :  { %2680 = vmatmul.mubr.msk.bf16.vlgmr.msra.gmra.mrb[44].mxu1 %vm582_vm11, %v1523_v40  ;;  %v1520_v35 = vmul.f32 %v2870_v44, %v2862_v18  ;;  %v2399_v18 = vld [vmem:[%s3513_s11 + $0x1] ss:$0 sm:$0xff] }
 0xfe3   :  { %2691 = vmatprep.mubr.msk.bf16.mxu1 %vm2895_vm9, %v2894_v9 }
 0xfe4   :  { %v1524_v53 = vpack.c.bf16 %v1520_v35, %v1520_v35 }
0x104b   :  { %v1511_v45 = vpop.xlane.xlu1 %1510 }
0x104c   :  { %2871 = vrcp.f32 %v1511_v45 }
0x104f   :  { %v1624_v46 = vpop.permute.xlu1 %1623  ;;  %v1514_v47 = vpop.xlane.xlu0 %1513 }
0x1050   :  { %v1629_v42 = vsel %vm141_vm2, %v1624_v46, 0  ;;  %2873 = vrcp.f32 %v1514_v47 }
0x1051   :  { %2690 = vmatpush3.bf16.msra.mxu1 %v1629_v42  ;;  %v2818_v42 = vld [vmem:[%s3514_s14 + $0x18] sm:$0xff]  }
0x1052   :  { %2701 = vmatprep.subr.bf16.mxu1 %v2894_v9 }
0x1053   :  { %v1576_v48 = vpop.permute.xlu0 %1575  ;;  %v1672_v50 = vpop.permute.xlu1 %1671 }
0x1054   :  { %v1581_v49 = vsel %vm141_vm2, %v1576_v48, 0  ;;  %v1677_v31 = vsel %vm141_vm2, %v1672_v50, 0 }
0x1055   :  { %2684 = vmatpush3.bf16.msra.mxu0 %v1581_v49 }
0x1056   :  { %v2872_v52 = vpop.eup %2871  ;;  %2695 = vmatprep.subr.bf16.mxu0 %v2894_v9 }
0x1057   :  { %v1521_v54 = vmul.f32 %v2872_v52, %v2864_v33 }
0x1058   :  { %2686 = vmatmul.mubr.msk.bf16.vlgmr.msra.gmra.mrb[32].mxu0 %vm582_vm11, %v1524_v53 }
0x1059   :  { %2696 = vmatpush3.bf16.msra.mxu0 %v1677_v31  ;;  %v1525_v11 = vpack.c.bf16 %v1521_v54, %v1521_v54  ;;  %2697 = vmatprep.mubr.msk.bf16.mxu0 %vm2895_vm9, %v2894_v9 }
0x105a   :  { %v2874_v12 = vpop.eup %2873  ;;  %2707 = vmatprep.subr.bf16.mxu0 %v2894_v9 }
0x105b   :  { %v1522_v32 = vmul.f32 %v2874_v12, %v2866_v19  ;;  %2692 = vmatmul.mubr.msk.bf16.vlgmr.msra.gmra.mrb[48].mxu1 %vm582_vm11, %v1525_v11  ;;  %v2402_v11 = vld [vmem:[%s3515_s12 + $0x1] ss:$0 sm:$0xff] }
0x105c   :  { %2703 = vmatprep.mubr.msk.bf16.mxu1 %vm2895_vm9, %v2894_v9  ;;  %2702 = vmatpush3.bf16.msra.mxu1 %v2816_v27 }
0x105d   :  { %v1526_v55 = vpack.c.bf16 %v1522_v32, %v1522_v32  ;;  %2713 = vmatprep.subr.bf16.mxu1 %v2894_v9 }
0x1060   :  { %2698 = vmatmul.mubr.msk.bf16.vlgmr.msra.gmra.mrb[36].mxu0 %vm582_vm11, %v1526_v55 }
0x1061   :  { %2709 = vmatprep.mubr.msk.bf16.mxu0 %vm2895_vm9, %v2894_v9  ;;  %2708 = vmatpush3.bf16.msra.mxu0 %v2815_v56  ;;  %v2403_v56 = vld [vmem:[%s3516_s13 + $0x1] ss:$0 sm:$0xff] }
0x1062   :  { %2721 = vmatprep.subr.bf16.mxu0 %v2894_v9 }
0x10b5   :  { %v1569_v57 = vpop.f32.mrb[44].mxu1 }
0x10b6   :  { %v2681_v58 = vpop.f32.mrb[45].mxu1 }
0x10b7   :  { %v1572_v60 = vpop.f32.mrb[46].mxu1 }
0x10b8   :  { %v2682_v61 = vpop.f32.mrb[47].mxu1 }
0x10b9   :  { %v2819_v61 = vld [vmem:[%s3517_s16 + $0x20] sm:$0xff]  }
0x112b   :  { %v1617_v62 = vpop.f32.mrb[32].mxu0 }
0x112c   :  { %v1724_v63 = vpack.c.bf16 %v1617_v62, %v1569_v57  ;;  %v2687_v0 = vpop.f32.mrb[33].mxu0  ;;  %v2820_v62 = vld [vmem:[%s3517_s16 + $0x28] sm:$0xff]  }
0x112d   :  { %v1620_v1 = vpop.f32.mrb[34].mxu0  ;;  %v2822_v0 = vld [vmem:[%s3517_s16 + $0x38] sm:$0xff]  }
0x112e   :  { %v2688_v2 = vpop.f32.mrb[35].mxu0  ;;  %v1665_v3 = vpop.f32.mrb[48].mxu1  ;;  %2710 = vmatmul.mubr.msk.bf16.vlgmr.msra.gmra.mrb[40].mxu0 %vm388_vm10, %v1724_v63  ;;  %v2821_v63 = vld [vmem:[%s3517_s16 + $0x30] sm:$0xff]   ;;  %v2409_v1 = vld [vmem:[%s3518_s15 + $0x1] ss:$0 sm:$0xff] }
0x112f   :  { %v2693_v4 = vpop.f32.mrb[49].mxu1  ;;  %2729 = vmatprep.mubr.msk.bf16.mxu0 %vm2895_vm9, %v2894_v9  ;;  %2722 = vmatpush3.bf16.msra.mxu0 %v2819_v61  ;;  %v2108_v61 = vmul.u32 8, %v3176_v43 }
0x1130   :  { %v1668_v5 = vpop.f32.mrb[50].mxu1  ;;  %2723 = vmatprep.subr.bf16.mxu0 %v2894_v9 }
0x1131   :  { %v2694_v6 = vpop.f32.mrb[51].mxu1  ;;  %vm2109_vm13 = vcmp.eq.s32.totalorder %v3082_v28, %v2108_v61  ;;  %v2824_v28 = vld [vmem:[%s3522_s20 + $0x8] sm:$0xff]  }
0x1132   :  { %vm2111_vm15 = vmand %vm2109_vm13, %vm2110_vm14 }
0x1133   :  { %v1713_v7 = vpop.f32.mrb[36].mxu0  ;;  %2724 = vmatpush3.bf16.msra.mxu0 %v2820_v62 }
0x1134   :  { %v1725_v8 = vpack.c.bf16 %v1713_v7, %v1665_v3  ;;  %v2699_v10 = vpop.f32.mrb[37].mxu0  ;;  %2725 = vmatprep.subr.bf16.mxu0 %v2894_v9 }
0x1135   :  { %v1716_v13 = vpop.f32.mrb[38].mxu0 }
0x1136   :  { %v2700_v51 = vpop.f32.mrb[39].mxu0  ;;  %2704 = vmatmul.mubr.msk.bf16.vlgmr.msra.gmra.mrb[52].mxu1 %vm388_vm10, %v1725_v8 }
0x1137   :  { %2717 = vmatprep.mubr.msk.bf16.mxu1 %vm2895_vm9, %v2894_v9  ;;  %2726 = vmatpush3.bf16.msra.mxu0 %v2821_v63 }
0x1138   :  { %2727 = vmatprep.subr.bf16.mxu0 %v2894_v9 }
0x113b   :  { %2728 = vmatpush3.bf16.msra.mxu0 %v2822_v0 }
0x113c   :  { %2748 = vmatprep.subr.bf16.mxu0 %v2894_v9 }
0x1201   :  { %v1819_v14 = vpop.f32.mrb[40].mxu0 }
0x1202   :  { %v2711_v15 = vpop.f32.mrb[41].mxu0 }
0x1203   :  { %v1822_v16 = vpop.f32.mrb[42].mxu0 }
0x1204   :  { %v2712_v59 = vpop.f32.mrb[43].mxu0 }
0x1209   :  { %v1769_v17 = vpop.f32.mrb[52].mxu1 }
0x120a   :  { %v1820_v22 = vadd.f32 %v1819_v14, %v1769_v17  ;;  %v2705_v24 = vpop.f32.mrb[53].mxu1 }
0x120b   :  { %v1772_v25 = vpop.f32.mrb[54].mxu1 }
0x120c   :  { %v1834_v26 = vadd.f32 %v2399_v18, %v1820_v22  ;;  %v1823_v29 = vadd.f32 %v1822_v16, %v1772_v25  ;;  %v2706_v30 = vpop.f32.mrb[55].mxu1 }
0x120e   :  { %v1835_v23 = vadd.f32 %v2399_v18, %v1823_v29  ;;  %v1836_v33 = vadd.f32 %v1834_v26, %v3307_v20 }
0x1210   :  { %v1842_v34 = vsel %vm224_vm8, %v1836_v33, 0.0  ;;  %v1837_v19 = vadd.f32 %v1835_v23, %v3309_v21  ;;  %v2817_v21 = vld [vmem:[%s3514_s14 + $0x10] sm:$0xff]  }
0x1211   :  { %1843 = vadd.xlane.f32.xlu0 %v1842_v34  ;;  %2714 = vmatpush3.bf16.msra.mxu1 %v2817_v21 }
0x1212   :  { %v1845_v36 = vsel %vm224_vm8, %v1837_v19, 0.0  ;;  %2715 = vmatprep.subr.bf16.mxu1 %v2894_v9 }
0x1213   :  { %1846 = vadd.xlane.f32.xlu1 %v1845_v36 }
0x1215   :  { %2716 = vmatpush3.bf16.msra.mxu1 %v2818_v42 }
0x129e   :  { %v1844_v37 = vpop.xlane.xlu0 %1843 }
0x129f   :  { %v1848_v38 = vmul.f32 0.03125, %v1844_v37 }
0x12a0   :  { %v1847_v39 = vpop.xlane.xlu1 %1846 }
0x12a1   :  { %v1850_v40 = vsub.f32 %v1836_v33, %v1848_v38  ;;  %v1849_v41 = vmul.f32 0.03125, %v1847_v39 }
0x12a3   :  { %v1851_v45 = vsub.f32 %v1837_v19, %v1849_v41  ;;  %v1852_v44 = vmul.f32 %v1850_v40, %v1850_v40  ;;  %v2422_v19 = vld [vmem:[%s3519_s17 + $0x1] ss:$0 sm:$0xff] }
0x12a5   :  { %v1854_v46 = vsel %vm224_vm8, %v1852_v44, 0.0  ;;  %v1853_v47 = vmul.f32 %v1851_v45, %v1851_v45 }
0x12a6   :  { %1855 = vadd.xlane.f32.xlu0 %v1854_v46 }
0x12a7   :  { %v1857_v20 = vsel %vm224_vm8, %v1853_v47, 0.0 }
0x12aa   :  { %1858 = vadd.xlane.f32.xlu0 %v1857_v20 }
0x1333   :  { %v1856_v35 = vpop.xlane.xlu0 %1855 }
0x1334   :  { %v1860_v48 = vmul.f32 0.03125, %v1856_v35 }
0x1336   :  { %v1862_v49 = vadd.f32 1e-12, %v1860_v48 }
0x1337   :  { %v1859_v50 = vpop.xlane.xlu0 %1858 }
0x1338   :  { %2875 = vrsqrt.f32 %v1862_v49  ;;  %v1861_v52 = vmul.f32 0.03125, %v1859_v50 }
0x133a   :  { %v1863_v53 = vadd.f32 1e-12, %v1861_v52 }
0x133c   :  { %2877 = vrsqrt.f32 %v1863_v53 }
0x1342   :  { %v2876_v54 = vpop.eup %2875 }
0x1343   :  { %v1866_v31 = vmul.f32 %v2876_v54, %v1850_v40 }
0x1345   :  { %v1874_v32 = vmul.f32 %v2402_v11, %v1866_v31  ;;  %v2900_v31 = vmov 0.0|0.0  }
0x1346   :  { %v2878_v12 = vpop.eup %2877  ;;  %2780 = vmatprep.subr.bf16.mxu1 %v2900_v31 }
0x1347   :  { %v1867_v55 = vmul.f32 %v2878_v12, %v1851_v45  ;;  %v1882_v57 = vadd.f32 %v2403_v56, %v1874_v32 }
0x1349   :  { %v1875_v27 = vmul.f32 %v2402_v11, %v1867_v55 }
0x134b   :  { %v1883_v58 = vadd.f32 %v2403_v56, %v1875_v27 }
0x134d   :  { %v1884_v60 = vpack.c.bf16 %v1883_v58, %v1882_v57 }
0x134f   :  { %2718 = vmatmul.mubr.msk.bf16.vlgmr.msra.gmra.mrb[56].mxu1 %vm224_vm8, %v1884_v60 }
0x1350   :  { %2737 = vmatprep.mubr.msk.f32.mxu1 %vm2895_vm9, %v2894_v9 }
0x1422   :  { %v1947_v2 = vpop.f32.mrb[56].mxu1 }
0x1423   :  { %v1948_v3 = vadd.f32 %v2409_v1, %v1947_v2  ;;  %v2719_v4 = vpop.f32.mrb[57].mxu1 }
0x1424   :  { %v1950_v5 = vpop.f32.mrb[58].mxu1 }
0x1425   :  { %v1954_v6 = vmul.f32 %v1948_v3, %v1948_v3  ;;  %v1951_v7 = vadd.f32 %v2409_v1, %v1950_v5  ;;  %v2720_v8 = vpop.f32.mrb[59].mxu1  ;;  %v2431_v1 = vld [vmem:[%s3521_s19 + $0x1] ss:$0 sm:$0xff] }
0x1427   :  { %v1956_v10 = vmul.f32 %v1954_v6, %v1948_v3  ;;  %v1955_v13 = vmul.f32 %v1951_v7, %v1951_v7  ;;  %v2432_v6 = vsel %vm2111_vm15, 1.0, %v2894_v9 }
0x1429   :  { %v1958_v51 = vmul.f32 0.044715, %v1956_v10  ;;  %v1957_v14 = vmul.f32 %v1955_v13, %v1951_v7  ;;  %v2825_v13 = vld [vmem:[%s3523_s22] sm:$0xff]  }
0x142b   :  { %v1960_v15 = vadd.f32 %v1958_v51, %v1948_v3  ;;  %v1959_v16 = vmul.f32 0.044715, %v1957_v14  ;;  %v2826_v51 = vld [vmem:[%s3523_s22 + $0x8] sm:$0xff]   ;;  %v2434_v14 = vld [vmem:[%s3524_s21] ss:$0 sm:$0xff] }
0x142d   :  { %v1962_v59 = vmul.f32 0.7978846, %v1960_v15  ;;  %v1961_v17 = vadd.f32 %v1959_v16, %v1951_v7 }
0x142f   :  { %2879 = vtanh.f32 %v1962_v59  ;;  %v1963_v18 = vmul.f32 0.7978846, %v1961_v17 }
0x1431   :  { %2881 = vtanh.f32 %v1963_v18 }
0x1439   :  { %v2880_v22 = vpop.eup %2879 }
0x143a   :  { %v1966_v24 = vadd.f32 1.0, %v2880_v22 }
0x143b   :  { %v2882_v25 = vpop.eup %2881 }
0x143c   :  { %v1968_v26 = vmul.f32 0.5, %v1966_v24  ;;  %v1967_v29 = vadd.f32 1.0, %v2882_v25 }
0x143e   :  { %v1969_v30 = vmul.f32 0.5, %v1967_v29  ;;  %v1970_v23 = vmul.f32 %v1968_v26, %v1948_v3 }
0x1440   :  { %v1971_v33 = vmul.f32 %v1969_v30, %v1951_v7  ;;  %v2823_v7 = vld [vmem:[%s3522_s20] sm:$0xff]  }
0x1442   :  { %v1972_v34 = vpack.c.bf16 %v1971_v33, %v1970_v23 }
0x1444   :  { %2730 = vmatmul.mubr.msk.bf16.vlgmr.msra.gmra.mrb[44].mxu0 %vm1110_vm12, %v1972_v34 }
0x1445   :  { %2752 = vmatprep.mubr.msk.bf16.mxu0 %vm2895_vm9, %v2894_v9  ;;  %2749 = vmatpush3.bf16.msra.mxu0 %v2825_v13 }
0x1446   :  { %2750 = vmatprep.subr.bf16.mxu0 %v2894_v9 }
0x1449   :  { %2751 = vmatpush3.bf16.msra.mxu0 %v2826_v51 }
0x1517   :  { %v2051_v36 = vpop.f32.mrb[44].mxu0 }
0x1518   :  { %v2052_v37 = vadd.f32 %v2422_v19, %v2051_v36  ;;  %v2731_v38 = vpop.f32.mrb[45].mxu0 }
0x1519   :  { %v2054_v39 = vpop.f32.mrb[46].mxu0 }
0x151a   :  { %v2055_v40 = vadd.f32 %v2422_v19, %v2054_v39  ;;  %v2732_v41 = vpop.f32.mrb[47].mxu0  ;;  %v2058_v45 = vadd.f32 %v2052_v37, %v1882_v57 }
0x151c   :  { %v2064_v44 = vsel %vm224_vm8, %v2058_v45, 0.0  ;;  %v2059_v46 = vadd.f32 %v2055_v40, %v1883_v58  ;;  %v2430_v58 = vld [vmem:[%s3520_s18 + $0x1] ss:$0 sm:$0xff] }
0x151d   :  { %2065 = vadd.xlane.f32.xlu1 %v2064_v44 }
0x151e   :  { %v2067_v47 = vsel %vm224_vm8, %v2059_v46, 0.0 }
0x151f   :  { %2068 = vadd.xlane.f32.xlu0 %v2067_v47 }
0x15aa   :  { %v2066_v20 = vpop.xlane.xlu1 %2065 }
0x15ab   :  { %v2070_v21 = vmul.f32 0.03125, %v2066_v20 }
0x15ac   :  { %v2069_v42 = vpop.xlane.xlu0 %2068 }
0x15ad   :  { %v2072_v35 = vsub.f32 %v2058_v45, %v2070_v21  ;;  %v2071_v48 = vmul.f32 0.03125, %v2069_v42 }
0x15af   :  { %v2073_v49 = vsub.f32 %v2059_v46, %v2071_v48  ;;  %v2074_v50 = vmul.f32 %v2072_v35, %v2072_v35 }
0x15b1   :  { %v2076_v52 = vsel %vm224_vm8, %v2074_v50, 0.0  ;;  %v2075_v53 = vmul.f32 %v2073_v49, %v2073_v49 }
0x15b2   :  { %2077 = vadd.xlane.f32.xlu1 %v2076_v52 }
0x15b3   :  { %v2079_v54 = vsel %vm224_vm8, %v2075_v53, 0.0 }
0x15b4   :  { %2080 = vadd.xlane.f32.xlu0 %v2079_v54 }
0x163f   :  { %v2078_v11 = vpop.xlane.xlu1 %2077 }
0x1640   :  { %v2082_v12 = vmul.f32 0.03125, %v2078_v11 }
0x1641   :  { %v2081_v32 = vpop.xlane.xlu0 %2080 }
0x1642   :  { %v2084_v55 = vadd.f32 1e-12, %v2082_v12  ;;  %v2083_v56 = vmul.f32 0.03125, %v2081_v32 }
0x1644   :  { %2883 = vrsqrt.f32 %v2084_v55  ;;  %v2085_v27 = vadd.f32 1e-12, %v2083_v56 }
0x1646   :  { %2885 = vrsqrt.f32 %v2085_v27 }
0x164e   :  { %v2884_v57 = vpop.eup %2883 }
0x164f   :  { %v2088_v60 = vmul.f32 %v2884_v57, %v2072_v35 }
0x1650   :  { %v2886_v62 = vpop.eup %2885 }
0x1651   :  { %v2089_v63 = vmul.f32 %v2886_v62, %v2073_v49  ;;  %v2096_v0 = vmul.f32 %v2430_v58, %v2088_v60 }
0x1653   :  { %v2097_v2 = vmul.f32 %v2430_v58, %v2089_v63  ;;  %v2104_v3 = vadd.f32 %v2431_v1, %v2096_v0 }
0x1655   :  { %v2105_v4 = vadd.f32 %v2431_v1, %v2097_v2 }
0x1657   :  { %v2781_v5 = vpack.c.bf16 %v2105_v4, %v2104_v3 }
0x1659   :  { %2782 = vmatpush3.bf16.msra.mxu1 %v2781_v5 }
0x165a   :  { %2740 = vmatprep.subr.bf16.mxu1 %v2894_v9 }
0x165c   :  { %2738 = vmatmul.mubr.msk.f32.vlgmr.msra.gmra.mrb[60].mxu1 %vm388_vm10, %v2432_v6 }
0x165d   :  { %2741 = vmatpush3.bf16.msra.mxu1 %v2823_v7  ;;  %2744 = vmatprep.mubr.msk.bf16.mxu1 %vm2895_vm9, %v2894_v9 }
0x165e   :  { %2742 = vmatprep.subr.bf16.mxu1 %v2894_v9  ;;  %v2438_v9 = vld [vmem:[%s3525_s23] ss:$0 sm:$0xff] }
0x1661   :  { %2743 = vmatpush3.bf16.msra.mxu1 %v2824_v28 }
0x172f   :  { %v2183_v43 = vpop.f32.mrb[60].mxu1 }
0x1730   :  { %v2187_v8 = vpack.c.bf16 %v2183_v43, %v2183_v43  ;;  %v2739_v10 = vpop.f32.mrb[61].mxu1 }
0x1732   :  { %2745 = vmatmul.mubr.msk.bf16.vlgmr.msra.gmra.mrb[64].mxu1 %vm224_vm8, %v2187_v8 }
0x1805   :  { %v2248_v15 = vpop.f32.mrb[64].mxu1 }
0x1806   :  { %v2249_v16 = vadd.f32 %v2434_v14, %v2248_v15  ;;  %v2746_v59 = vpop.f32.mrb[65].mxu1 }
0x1807   :  { %v2251_v17 = vpop.f32.mrb[66].mxu1 }
0x1808   :  { %2887 = vtanh.f32 %v2249_v16  ;;  %v2747_v18 = vpop.f32.mrb[67].mxu1 }
0x1812   :  { %v2888_v22 = vpop.eup %2887 }
0x1813   :  { %v2255_v24 = vpack.c.bf16 %v2888_v22, %v2888_v22 }
0x1815   :  { %2753 = vmatmul.mubr.msk.bf16.vlgmr.msra.gmra.mrb[48].mxu0 %vm224_vm8, %v2255_v24 }
0x18e8   :  { %v2316_v25 = vpop.f32.mrb[48].mxu0 }
0x18e9   :  { %v2317_v26 = vadd.f32 %v2438_v9, %v2316_v25  ;;  %v2754_v29 = vpop.f32.mrb[49].mxu0 }
0x18ea   :  { %v2319_v30 = vpop.f32.mrb[50].mxu0 }
0x18eb   :  { %v2322_v23 = vsub.f32 0.0, %v2317_v26  ;;  %v2755_v33 = vpop.f32.mrb[51].mxu0 }
0x18ed   :  { %v2323_v34 = vmul.f32 1.442695, %v2322_v23 }
0x18ef   :  { %2889 = vpow2.f32 %v2323_v34 }
0x18f9   :  { %v2890_v19 = vpop.eup %2889 }
0x18fa   :  { %v2325_v36 = vadd.f32 1.0, %v2890_v19 }
0x18fc   :  { %2891 = vrcp.f32 %v2325_v36 }
0x1906   :  { %v2892_v37 = vpop.eup %2891 }
0x1907   :  { %2328 = vst [vmem:[%s3526_s24] sm:$0xff] %v2892_v37 }

</bundles_post_ra>
